<compile_context>
chip_gen: v7x
topology: tpu7x:2x2x1
jax: 0.10.0
libtpu: 0.0.40
codegen_flags: <defaults>
</compile_context>

<pallas_src>
import math

import jax
import jax.numpy as jnp
from jax.experimental import pallas as pl
from jax.experimental.pallas import tpu as pltpu  # noqa: F401  (kept for TPU-specific tuning hooks)

# ----- model hyper-params (small, consistent with the module) -----
BATCH = 2
SEQ = 8
HIDDEN = 32
HEADS = 4
HEAD_DIM = HIDDEN // HEADS
MLP_RATIO = 4.0
MLP_HIDDEN = int(HIDDEN * MLP_RATIO)
EPS = 1e-6


def _layernorm(x, eps=EPS):
    # LayerNorm(elementwise_affine=False) over last dim
    mean = jnp.mean(x, axis=-1, keepdims=True)
    var = jnp.mean((x - mean) ** 2, axis=-1, keepdims=True)
    return (x - mean) * jax.lax.rsqrt(var + eps)


def _gelu_tanh(x):
    # nn.GELU(approximate='tanh')
    k = math.sqrt(2.0 / math.pi)
    return 0.5 * x * (1.0 + jnp.tanh(k * (x + 0.044715 * x * x * x)))


def dit_block_kernel(x_ref, c_ref,
                     w_ada_ref, b_ada_ref,      # (6, D, D), (6, 1, D)
                     w_qkv_ref, b_qkv_ref,      # (3, D, D), (3, 1, D)
                     w_proj_ref, b_proj_ref,    # (D, D),    (1, D)
                     w_fc1_ref, b_fc1_ref,      # (D, M),    (1, M)
                     w_fc2_ref, b_fc2_ref,      # (M, D),    (1, D)
                     o_ref):
    B, N, D = x_ref.shape
    T = B * N

    x = x_ref[...]          # (B, N, D)
    c = c_ref[...]          # (B, D)

    # ---- adaLN-Zero modulation: SiLU(c) @ W_k + b_k, one leading-axis chunk per k ----
    c_silu = c * jax.nn.sigmoid(c)

    def ada_chunk(kk):      # -> (B, 1, D)
        m = jnp.dot(c_silu, w_ada_ref[kk],
                    preferred_element_type=jnp.float32) + b_ada_ref[kk]
        return m[:, None, :]

    shift_msa, scale_msa, gate_msa = ada_chunk(0), ada_chunk(1), ada_chunk(2)
    shift_mlp, scale_mlp, gate_mlp = ada_chunk(3), ada_chunk(4), ada_chunk(5)

    # ---- attention branch: modulate(norm1(x)) -> MHA -> proj ----
    attn_in = _layernorm(x) * (1.0 + scale_msa) + shift_msa        # (B, N, D)
    a2 = attn_in.reshape(T, D)                                     # batch-collapsed M=16
    q = jnp.dot(a2, w_qkv_ref[0], preferred_element_type=jnp.float32) + b_qkv_ref[0]
    k = jnp.dot(a2, w_qkv_ref[1], preferred_element_type=jnp.float32) + b_qkv_ref[1]
    v = jnp.dot(a2, w_qkv_ref[2], preferred_element_type=jnp.float32) + b_qkv_ref[2]

    def split_heads(t):     # (T, D) -> (HEADS*B, N, HEAD_DIM), g = h*B + b
        hs = [t[:, h * HEAD_DIM:(h + 1) * HEAD_DIM] for h in range(HEADS)]
        return jnp.stack(hs, axis=0).reshape(HEADS * B, N, HEAD_DIM)

    qh, kh, vh = split_heads(q), split_heads(k), split_heads(v)
    scale = 1.0 / math.sqrt(HEAD_DIM)
    # Batched over the fused (head, batch) axis; contraction on the last dims
    # (no explicit k-transpose materialized).
    s = jnp.einsum('gqd,gkd->gqk', qh, kh,
                   preferred_element_type=jnp.float32) * scale      # (H*B, N, N)
    s = s - jnp.max(s, axis=-1, keepdims=True)
    p = jnp.exp(s)
    p = p * pl.reciprocal(jnp.sum(p, axis=-1, keepdims=True), approx=False)
    ctx = jnp.einsum('gqk,gkd->gqd', p, vh,
                     preferred_element_type=jnp.float32)            # (H*B, N, Dh)
    ctx = ctx.reshape(HEADS, T, HEAD_DIM)
    ctx2d = jnp.concatenate([ctx[h] for h in range(HEADS)], axis=-1)  # (T, D)

    attn_out = jnp.dot(ctx2d, w_proj_ref[...],
                       preferred_element_type=jnp.float32) + b_proj_ref[...]
    x = x + gate_msa * attn_out.reshape(B, N, D)

    # ---- MLP branch: modulate(norm2(x)) -> fc1 -> GELU(tanh) -> fc2 ----
    mlp_in = (_layernorm(x) * (1.0 + scale_mlp) + shift_mlp).reshape(T, D)
    h1 = jnp.dot(mlp_in, w_fc1_ref[...], preferred_element_type=jnp.float32) + b_fc1_ref[...]
    h1 = _gelu_tanh(h1)
    h2 = jnp.dot(h1, w_fc2_ref[...], preferred_element_type=jnp.float32) + b_fc2_ref[...]

    x = x + gate_mlp * h2.reshape(B, N, D)
    o_ref[...] = x.astype(o_ref.dtype)     # single contiguous full-block store


def dit_block(x, c, params, idx_h=None, idx_w=None):
    """Pallas call wrapper (use_rotary_attn=False path). idx_h / idx_w are unused."""
    del idx_h, idx_w  # TODO(synk): rotary attention path not implemented
    (w_ada, b_ada, w_qkv, b_qkv, w_proj, b_proj,
     w_fc1, b_fc1, w_fc2, b_fc2) = params
    B, N, D = x.shape

    # Re-pack chunked weights so the kernel indexes chunks on a leading axis
    # (cheap leading-axis reads) instead of slicing sub-128-lane ranges of a
    # wide matmul result.  Pure layout plumbing, done once outside the kernel.
    w_ada_p = jnp.transpose(w_ada.reshape(D, 6, D), (1, 0, 2))   # (6, D, D)
    b_ada_p = b_ada.reshape(6, 1, D)                              # (6, 1, D)
    w_qkv_p = jnp.transpose(w_qkv.reshape(D, 3, D), (1, 0, 2))   # (3, D, D)
    b_qkv_p = b_qkv.reshape(3, 1, D)                              # (3, 1, D)

    # Single invocation (no grid): at this size a per-batch grid is pure
    # per-step overhead on single-TC v5e/v6e, and all operands (~60 KB) fit VMEM.
    # (On v7x a grid=(B,) "parallel" split across the 2 TCs could be re-tried.)
    return pl.pallas_call(
        dit_block_kernel,
        out_shape=jax.ShapeDtypeStruct((B, N, D), x.dtype),
    )(x, c, w_ada_p, b_ada_p, w_qkv_p, b_qkv_p,
      w_proj, b_proj, w_fc1, b_fc1, w_fc2, b_fc2)


def ref_dit_block(x, c, params):
    """Pure-JAX reference of the same forward pass (for correctness check)."""
    (w_ada, b_ada, w_qkv, b_qkv, w_proj, b_proj,
     w_fc1, b_fc1, w_fc2, b_fc2) = params
    D = HIDDEN
    mod = (c * jax.nn.sigmoid(c)) @ w_ada + b_ada                   # (B, 6D)
    shift_msa, scale_msa, gate_msa, shift_mlp, scale_mlp, gate_mlp = jnp.split(mod, 6, axis=1)

    def modulate(y, shift, scale):
        return y * (1.0 + scale[:, None, :]) + shift[:, None, :]

    attn_in = modulate(_layernorm(x), shift_msa, scale_msa)
    qkv = attn_in @ w_qkv + b_qkv                                   # (B, N, 3D)
    q, k, v = jnp.split(qkv, 3, axis=-1)
    B, N, _ = x.shape
    q = q.reshape(B, N, HEADS, HEAD_DIM).transpose(0, 2, 1, 3)
    k = k.reshape(B, N, HEADS, HEAD_DIM).transpose(0, 2, 1, 3)
    v = v.reshape(B, N, HEADS, HEAD_DIM).transpose(0, 2, 1, 3)
    scores = jnp.einsum('bhqd,bhkd->bhqk', q, k) / math.sqrt(HEAD_DIM)
    p = jax.nn.softmax(scores, axis=-1)
    attn = jnp.einsum('bhqk,bhkd->bhqd', p, v).transpose(0, 2, 1, 3).reshape(B, N, D)
    attn = attn @ w_proj + b_proj
    x = x + gate_msa[:, None, :] * attn

    mlp_in = modulate(_layernorm(x), shift_mlp, scale_mlp)
    h1 = _gelu_tanh(mlp_in @ w_fc1 + b_fc1)
    h2 = h1 @ w_fc2 + b_fc2
    x = x + gate_mlp[:, None, :] * h2
    return x


def make_params(key):
    ks = jax.random.split(key, 10)
    s = 0.05
    D, M = HIDDEN, MLP_HIDDEN
    w_ada  = jax.random.normal(ks[0], (D, 6 * D), jnp.float32) * s
    b_ada  = jax.random.normal(ks[1], (1, 6 * D), jnp.float32) * s
    w_qkv  = jax.random.normal(ks[2], (D, 3 * D), jnp.float32) * s
    b_qkv  = jax.random.normal(ks[3], (1, 3 * D), jnp.float32) * s
    w_proj = jax.random.normal(ks[4], (D, D), jnp.float32) * s
    b_proj = jax.random.normal(ks[5], (1, D), jnp.float32) * s
    w_fc1  = jax.random.normal(ks[6], (D, M), jnp.float32) * s
    b_fc1  = jax.random.normal(ks[7], (1, M), jnp.float32) * s
    w_fc2  = jax.random.normal(ks[8], (M, D), jnp.float32) * s
    b_fc2  = jax.random.normal(ks[9], (1, D), jnp.float32) * s
    return (w_ada, b_ada, w_qkv, b_qkv, w_proj, b_proj,
            w_fc1, b_fc1, w_fc2, b_fc2)


if __name__ == "__main__":
    key = jax.random.PRNGKey(0)
    kx, kc, kp = jax.random.split(key, 3)
    x = jax.random.normal(kx, (BATCH, SEQ, HIDDEN), jnp.float32)
    c = jax.random.normal(kc, (BATCH, HIDDEN), jnp.float32)
    # idx_h / idx_w placeholders (unused for the non-rotary attention path)
    idx_h = jnp.zeros((BATCH, SEQ), jnp.int32)
    idx_w = jnp.zeros((BATCH, SEQ), jnp.int32)
    params = make_params(kp)

    out = dit_block(x, c, params, idx_h, idx_w)
    out = jax.block_until_ready(out)

    ref = ref_dit_block(x, c, params)
    assert out.shape == (BATCH, SEQ, HIDDEN)
    assert jnp.allclose(out, ref, rtol=1e-5, atol=1e-5), \
        f"max abs err = {jnp.max(jnp.abs(out - ref))}"

    print("KERNEL_OK")
</pallas_src>

<mosaic_0001>
module attributes {stable_mosaic.version = 11 : i64} {
  func.func @dit_block_kernel(%arg0: memref<2x8x32xf32, #tpu.memory_space<vmem>>, %arg1: memref<2x32xf32, #tpu.memory_space<vmem>>, %arg2: memref<6x32x32xf32, #tpu.memory_space<vmem>>, %arg3: memref<6x1x32xf32, #tpu.memory_space<vmem>>, %arg4: memref<3x32x32xf32, #tpu.memory_space<vmem>>, %arg5: memref<3x1x32xf32, #tpu.memory_space<vmem>>, %arg6: memref<32x32xf32, #tpu.memory_space<vmem>>, %arg7: memref<1x32xf32, #tpu.memory_space<vmem>>, %arg8: memref<32x128xf32, #tpu.memory_space<vmem>>, %arg9: memref<1x128xf32, #tpu.memory_space<vmem>>, %arg10: memref<128x32xf32, #tpu.memory_space<vmem>>, %arg11: memref<1x32xf32, #tpu.memory_space<vmem>>, %arg12: memref<2x8x32xf32, #tpu.memory_space<vmem>>) attributes {dimension_semantics = [], scalar_prefetch = 0 : i64, scratch_operands = 0 : i64, tpu.core_type = #tpu.core_type<tc>} {
    %c0 = arith.constant 0 : index
    %c0_0 = arith.constant 0 : index
    %c0_1 = arith.constant 0 : index
    %0 = vector.load %arg0[%c0, %c0_0, %c0_1] : memref<2x8x32xf32, #tpu.memory_space<vmem>>, vector<2x8x32xf32>
    %c0_2 = arith.constant 0 : index
    %c0_3 = arith.constant 0 : index
    %1 = vector.load %arg1[%c0_2, %c0_3] : memref<2x32xf32, #tpu.memory_space<vmem>>, vector<2x32xf32>
    %2 = arith.negf %1 : vector<2x32xf32>
    %3 = math.exp %2 : vector<2x32xf32>
    %cst = arith.constant 1.000000e+00 : f32
    %4 = vector.broadcast %cst : f32 to vector<2x32xf32>
    %5 = arith.addf %4, %3 : vector<2x32xf32>
    %6 = arith.divf %4, %5 : vector<2x32xf32>
    %7 = arith.mulf %1, %6 : vector<2x32xf32>
    %c0_4 = arith.constant 0 : index
    %c0_5 = arith.constant 0 : index
    %c0_6 = arith.constant 0 : index
    %8 = vector.load %arg2[%c0_4, %c0_5, %c0_6] : memref<6x32x32xf32, #tpu.memory_space<vmem>>, vector<1x32x32xf32>
    %9 = vector.shape_cast %8 : vector<1x32x32xf32> to vector<32x32xf32>
    %cst_7 = arith.constant dense<0.000000e+00> : vector<2x32xf32>
    %10 = tpu.matmul %7, %9, %cst_7 {dimension_numbers = #tpu.dot_dimension_numbers<[1], [0], [0], [1], [0, 0, 1, 1], [], []>} : vector<2x32xf32>, vector<32x32xf32>, vector<2x32xf32> -> vector<2x32xf32>
    %c0_8 = arith.constant 0 : index
    %c0_9 = arith.constant 0 : index
    %c0_10 = arith.constant 0 : index
    %11 = vector.load %arg3[%c0_8, %c0_9, %c0_10] : memref<6x1x32xf32, #tpu.memory_space<vmem>>, vector<1x1x32xf32>
    %12 = vector.shape_cast %11 : vector<1x1x32xf32> to vector<1x32xf32>
    %13 = vector.broadcast %12 : vector<1x32xf32> to vector<2x32xf32>
    %14 = arith.addf %10, %13 : vector<2x32xf32>
    %15 = vector.shape_cast %14 : vector<2x32xf32> to vector<2x1x32xf32>
    %c1 = arith.constant 1 : index
    %c0_11 = arith.constant 0 : index
    %c0_12 = arith.constant 0 : index
    %16 = vector.load %arg2[%c1, %c0_11, %c0_12] : memref<6x32x32xf32, #tpu.memory_space<vmem>>, vector<1x32x32xf32>
    %17 = vector.shape_cast %16 : vector<1x32x32xf32> to vector<32x32xf32>
    %cst_13 = arith.constant dense<0.000000e+00> : vector<2x32xf32>
    %18 = tpu.matmul %7, %17, %cst_13 {dimension_numbers = #tpu.dot_dimension_numbers<[1], [0], [0], [1], [0, 0, 1, 1], [], []>} : vector<2x32xf32>, vector<32x32xf32>, vector<2x32xf32> -> vector<2x32xf32>
    %c1_14 = arith.constant 1 : index
    %c0_15 = arith.constant 0 : index
    %c0_16 = arith.constant 0 : index
    %19 = vector.load %arg3[%c1_14, %c0_15, %c0_16] : memref<6x1x32xf32, #tpu.memory_space<vmem>>, vector<1x1x32xf32>
    %20 = vector.shape_cast %19 : vector<1x1x32xf32> to vector<1x32xf32>
    %21 = vector.broadcast %20 : vector<1x32xf32> to vector<2x32xf32>
    %22 = arith.addf %18, %21 : vector<2x32xf32>
    %23 = vector.shape_cast %22 : vector<2x32xf32> to vector<2x1x32xf32>
    %c2 = arith.constant 2 : index
    %c0_17 = arith.constant 0 : index
    %c0_18 = arith.constant 0 : index
    %24 = vector.load %arg2[%c2, %c0_17, %c0_18] : memref<6x32x32xf32, #tpu.memory_space<vmem>>, vector<1x32x32xf32>
    %25 = vector.shape_cast %24 : vector<1x32x32xf32> to vector<32x32xf32>
    %cst_19 = arith.constant dense<0.000000e+00> : vector<2x32xf32>
    %26 = tpu.matmul %7, %25, %cst_19 {dimension_numbers = #tpu.dot_dimension_numbers<[1], [0], [0], [1], [0, 0, 1, 1], [], []>} : vector<2x32xf32>, vector<32x32xf32>, vector<2x32xf32> -> vector<2x32xf32>
    %c2_20 = arith.constant 2 : index
    %c0_21 = arith.constant 0 : index
    %c0_22 = arith.constant 0 : index
    %27 = vector.load %arg3[%c2_20, %c0_21, %c0_22] : memref<6x1x32xf32, #tpu.memory_space<vmem>>, vector<1x1x32xf32>
    %28 = vector.shape_cast %27 : vector<1x1x32xf32> to vector<1x32xf32>
    %29 = vector.broadcast %28 : vector<1x32xf32> to vector<2x32xf32>
    %30 = arith.addf %26, %29 : vector<2x32xf32>
    %31 = vector.shape_cast %30 : vector<2x32xf32> to vector<2x1x32xf32>
    %c3 = arith.constant 3 : index
    %c0_23 = arith.constant 0 : index
    %c0_24 = arith.constant 0 : index
    %32 = vector.load %arg2[%c3, %c0_23, %c0_24] : memref<6x32x32xf32, #tpu.memory_space<vmem>>, vector<1x32x32xf32>
    %33 = vector.shape_cast %32 : vector<1x32x32xf32> to vector<32x32xf32>
    %cst_25 = arith.constant dense<0.000000e+00> : vector<2x32xf32>
    %34 = tpu.matmul %7, %33, %cst_25 {dimension_numbers = #tpu.dot_dimension_numbers<[1], [0], [0], [1], [0, 0, 1, 1], [], []>} : vector<2x32xf32>, vector<32x32xf32>, vector<2x32xf32> -> vector<2x32xf32>
    %c3_26 = arith.constant 3 : index
    %c0_27 = arith.constant 0 : index
    %c0_28 = arith.constant 0 : index
    %35 = vector.load %arg3[%c3_26, %c0_27, %c0_28] : memref<6x1x32xf32, #tpu.memory_space<vmem>>, vector<1x1x32xf32>
    %36 = vector.shape_cast %35 : vector<1x1x32xf32> to vector<1x32xf32>
    %37 = vector.broadcast %36 : vector<1x32xf32> to vector<2x32xf32>
    %38 = arith.addf %34, %37 : vector<2x32xf32>
    %39 = vector.shape_cast %38 : vector<2x32xf32> to vector<2x1x32xf32>
    %c4 = arith.constant 4 : index
    %c0_29 = arith.constant 0 : index
    %c0_30 = arith.constant 0 : index
    %40 = vector.load %arg2[%c4, %c0_29, %c0_30] : memref<6x32x32xf32, #tpu.memory_space<vmem>>, vector<1x32x32xf32>
    %41 = vector.shape_cast %40 : vector<1x32x32xf32> to vector<32x32xf32>
    %cst_31 = arith.constant dense<0.000000e+00> : vector<2x32xf32>
    %42 = tpu.matmul %7, %41, %cst_31 {dimension_numbers = #tpu.dot_dimension_numbers<[1], [0], [0], [1], [0, 0, 1, 1], [], []>} : vector<2x32xf32>, vector<32x32xf32>, vector<2x32xf32> -> vector<2x32xf32>
    %c4_32 = arith.constant 4 : index
    %c0_33 = arith.constant 0 : index
    %c0_34 = arith.constant 0 : index
    %43 = vector.load %arg3[%c4_32, %c0_33, %c0_34] : memref<6x1x32xf32, #tpu.memory_space<vmem>>, vector<1x1x32xf32>
    %44 = vector.shape_cast %43 : vector<1x1x32xf32> to vector<1x32xf32>
    %45 = vector.broadcast %44 : vector<1x32xf32> to vector<2x32xf32>
    %46 = arith.addf %42, %45 : vector<2x32xf32>
    %47 = vector.shape_cast %46 : vector<2x32xf32> to vector<2x1x32xf32>
    %c5 = arith.constant 5 : index
    %c0_35 = arith.constant 0 : index
    %c0_36 = arith.constant 0 : index
    %48 = vector.load %arg2[%c5, %c0_35, %c0_36] : memref<6x32x32xf32, #tpu.memory_space<vmem>>, vector<1x32x32xf32>
    %49 = vector.shape_cast %48 : vector<1x32x32xf32> to vector<32x32xf32>
    %cst_37 = arith.constant dense<0.000000e+00> : vector<2x32xf32>
    %50 = tpu.matmul %7, %49, %cst_37 {dimension_numbers = #tpu.dot_dimension_numbers<[1], [0], [0], [1], [0, 0, 1, 1], [], []>} : vector<2x32xf32>, vector<32x32xf32>, vector<2x32xf32> -> vector<2x32xf32>
    %c5_38 = arith.constant 5 : index
    %c0_39 = arith.constant 0 : index
    %c0_40 = arith.constant 0 : index
    %51 = vector.load %arg3[%c5_38, %c0_39, %c0_40] : memref<6x1x32xf32, #tpu.memory_space<vmem>>, vector<1x1x32xf32>
    %52 = vector.shape_cast %51 : vector<1x1x32xf32> to vector<1x32xf32>
    %53 = vector.broadcast %52 : vector<1x32xf32> to vector<2x32xf32>
    %54 = arith.addf %50, %53 : vector<2x32xf32>
    %55 = vector.shape_cast %54 : vector<2x32xf32> to vector<2x1x32xf32>
    %cst_41 = arith.constant dense<0.000000e+00> : vector<2x8xf32>
    %56 = vector.multi_reduction <add>, %0, %cst_41 [2] : vector<2x8x32xf32> to vector<2x8xf32>
    %57 = vector.shape_cast %56 : vector<2x8xf32> to vector<2x8x1xf32>
    %cst_42 = arith.constant 3.200000e+01 : f32
    %58 = vector.broadcast %cst_42 : f32 to vector<2x8x1xf32>
    %59 = arith.divf %57, %58 : vector<2x8x1xf32>
    %60 = vector.broadcast %59 : vector<2x8x1xf32> to vector<2x8x32xf32>
    %61 = arith.subf %0, %60 : vector<2x8x32xf32>
    %62 = arith.mulf %61, %61 : vector<2x8x32xf32>
    %cst_43 = arith.constant dense<0.000000e+00> : vector<2x8xf32>
    %63 = vector.multi_reduction <add>, %62, %cst_43 [2] : vector<2x8x32xf32> to vector<2x8xf32>
    %64 = vector.shape_cast %63 : vector<2x8xf32> to vector<2x8x1xf32>
    %cst_44 = arith.constant 3.200000e+01 : f32
    %65 = vector.broadcast %cst_44 : f32 to vector<2x8x1xf32>
    %66 = arith.divf %64, %65 : vector<2x8x1xf32>
    %67 = vector.broadcast %59 : vector<2x8x1xf32> to vector<2x8x32xf32>
    %68 = arith.subf %0, %67 : vector<2x8x32xf32>
    %cst_45 = arith.constant 9.99999997E-7 : f32
    %69 = vector.broadcast %cst_45 : f32 to vector<2x8x1xf32>
    %70 = arith.addf %66, %69 : vector<2x8x1xf32>
    %71 = math.rsqrt %70 : vector<2x8x1xf32>
    %72 = vector.broadcast %71 : vector<2x8x1xf32> to vector<2x8x32xf32>
    %73 = arith.mulf %68, %72 : vector<2x8x32xf32>
    %cst_46 = arith.constant 1.000000e+00 : f32
    %74 = vector.broadcast %cst_46 : f32 to vector<2x1x32xf32>
    %75 = arith.addf %74, %23 : vector<2x1x32xf32>
    %76 = vector.broadcast %75 : vector<2x1x32xf32> to vector<2x8x32xf32>
    %77 = arith.mulf %73, %76 : vector<2x8x32xf32>
    %78 = vector.broadcast %15 : vector<2x1x32xf32> to vector<2x8x32xf32>
    %79 = arith.addf %77, %78 : vector<2x8x32xf32>
    %80 = vector.shape_cast %79 : vector<2x8x32xf32> to vector<16x32xf32>
    %c0_47 = arith.constant 0 : index
    %c0_48 = arith.constant 0 : index
    %c0_49 = arith.constant 0 : index
    %81 = vector.load %arg4[%c0_47, %c0_48, %c0_49] : memref<3x32x32xf32, #tpu.memory_space<vmem>>, vector<1x32x32xf32>
    %82 = vector.shape_cast %81 : vector<1x32x32xf32> to vector<32x32xf32>
    %cst_50 = arith.constant dense<0.000000e+00> : vector<16x32xf32>
    %83 = tpu.matmul %80, %82, %cst_50 {dimension_numbers = #tpu.dot_dimension_numbers<[1], [0], [0], [1], [0, 0, 1, 1], [], []>} : vector<16x32xf32>, vector<32x32xf32>, vector<16x32xf32> -> vector<16x32xf32>
    %c0_51 = arith.constant 0 : index
    %c0_52 = arith.constant 0 : index
    %c0_53 = arith.constant 0 : index
    %84 = vector.load %arg5[%c0_51, %c0_52, %c0_53] : memref<3x1x32xf32, #tpu.memory_space<vmem>>, vector<1x1x32xf32>
    %85 = vector.shape_cast %84 : vector<1x1x32xf32> to vector<1x32xf32>
    %86 = vector.broadcast %85 : vector<1x32xf32> to vector<16x32xf32>
    %87 = arith.addf %83, %86 : vector<16x32xf32>
    %c1_54 = arith.constant 1 : index
    %c0_55 = arith.constant 0 : index
    %c0_56 = arith.constant 0 : index
    %88 = vector.load %arg4[%c1_54, %c0_55, %c0_56] : memref<3x32x32xf32, #tpu.memory_space<vmem>>, vector<1x32x32xf32>
    %89 = vector.shape_cast %88 : vector<1x32x32xf32> to vector<32x32xf32>
    %cst_57 = arith.constant dense<0.000000e+00> : vector<16x32xf32>
    %90 = tpu.matmul %80, %89, %cst_57 {dimension_numbers = #tpu.dot_dimension_numbers<[1], [0], [0], [1], [0, 0, 1, 1], [], []>} : vector<16x32xf32>, vector<32x32xf32>, vector<16x32xf32> -> vector<16x32xf32>
    %c1_58 = arith.constant 1 : index
    %c0_59 = arith.constant 0 : index
    %c0_60 = arith.constant 0 : index
    %91 = vector.load %arg5[%c1_58, %c0_59, %c0_60] : memref<3x1x32xf32, #tpu.memory_space<vmem>>, vector<1x1x32xf32>
    %92 = vector.shape_cast %91 : vector<1x1x32xf32> to vector<1x32xf32>
    %93 = vector.broadcast %92 : vector<1x32xf32> to vector<16x32xf32>
    %94 = arith.addf %90, %93 : vector<16x32xf32>
    %c2_61 = arith.constant 2 : index
    %c0_62 = arith.constant 0 : index
    %c0_63 = arith.constant 0 : index
    %95 = vector.load %arg4[%c2_61, %c0_62, %c0_63] : memref<3x32x32xf32, #tpu.memory_space<vmem>>, vector<1x32x32xf32>
    %96 = vector.shape_cast %95 : vector<1x32x32xf32> to vector<32x32xf32>
    %cst_64 = arith.constant dense<0.000000e+00> : vector<16x32xf32>
    %97 = tpu.matmul %80, %96, %cst_64 {dimension_numbers = #tpu.dot_dimension_numbers<[1], [0], [0], [1], [0, 0, 1, 1], [], []>} : vector<16x32xf32>, vector<32x32xf32>, vector<16x32xf32> -> vector<16x32xf32>
    %c2_65 = arith.constant 2 : index
    %c0_66 = arith.constant 0 : index
    %c0_67 = arith.constant 0 : index
    %98 = vector.load %arg5[%c2_65, %c0_66, %c0_67] : memref<3x1x32xf32, #tpu.memory_space<vmem>>, vector<1x1x32xf32>
    %99 = vector.shape_cast %98 : vector<1x1x32xf32> to vector<1x32xf32>
    %100 = vector.broadcast %99 : vector<1x32xf32> to vector<16x32xf32>
    %101 = arith.addf %97, %100 : vector<16x32xf32>
    %102 = vector.extract_strided_slice %87 {offsets = [0, 0], sizes = [16, 8], strides = [1, 1]} : vector<16x32xf32> to vector<16x8xf32>
    %103 = vector.extract_strided_slice %87 {offsets = [0, 8], sizes = [16, 8], strides = [1, 1]} : vector<16x32xf32> to vector<16x8xf32>
    %104 = vector.extract_strided_slice %87 {offsets = [0, 16], sizes = [16, 8], strides = [1, 1]} : vector<16x32xf32> to vector<16x8xf32>
    %105 = vector.extract_strided_slice %87 {offsets = [0, 24], sizes = [16, 8], strides = [1, 1]} : vector<16x32xf32> to vector<16x8xf32>
    %106 = vector.shape_cast %102 : vector<16x8xf32> to vector<1x16x8xf32>
    %107 = vector.shape_cast %103 : vector<16x8xf32> to vector<1x16x8xf32>
    %108 = vector.shape_cast %104 : vector<16x8xf32> to vector<1x16x8xf32>
    %109 = vector.shape_cast %105 : vector<16x8xf32> to vector<1x16x8xf32>
    %110 = tpu.concatenate %106, %107, %108, %109 in 0 : vector<1x16x8xf32>, vector<1x16x8xf32>, vector<1x16x8xf32>, vector<1x16x8xf32> -> vector<4x16x8xf32>
    %111 = vector.shape_cast %110 : vector<4x16x8xf32> to vector<8x8x8xf32>
    %112 = vector.extract_strided_slice %94 {offsets = [0, 0], sizes = [16, 8], strides = [1, 1]} : vector<16x32xf32> to vector<16x8xf32>
    %113 = vector.extract_strided_slice %94 {offsets = [0, 8], sizes = [16, 8], strides = [1, 1]} : vector<16x32xf32> to vector<16x8xf32>
    %114 = vector.extract_strided_slice %94 {offsets = [0, 16], sizes = [16, 8], strides = [1, 1]} : vector<16x32xf32> to vector<16x8xf32>
    %115 = vector.extract_strided_slice %94 {offsets = [0, 24], sizes = [16, 8], strides = [1, 1]} : vector<16x32xf32> to vector<16x8xf32>
    %116 = vector.shape_cast %112 : vector<16x8xf32> to vector<1x16x8xf32>
    %117 = vector.shape_cast %113 : vector<16x8xf32> to vector<1x16x8xf32>
    %118 = vector.shape_cast %114 : vector<16x8xf32> to vector<1x16x8xf32>
    %119 = vector.shape_cast %115 : vector<16x8xf32> to vector<1x16x8xf32>
    %120 = tpu.concatenate %116, %117, %118, %119 in 0 : vector<1x16x8xf32>, vector<1x16x8xf32>, vector<1x16x8xf32>, vector<1x16x8xf32> -> vector<4x16x8xf32>
    %121 = vector.shape_cast %120 : vector<4x16x8xf32> to vector<8x8x8xf32>
    %122 = vector.extract_strided_slice %101 {offsets = [0, 0], sizes = [16, 8], strides = [1, 1]} : vector<16x32xf32> to vector<16x8xf32>
    %123 = vector.extract_strided_slice %101 {offsets = [0, 8], sizes = [16, 8], strides = [1, 1]} : vector<16x32xf32> to vector<16x8xf32>
    %124 = vector.extract_strided_slice %101 {offsets = [0, 16], sizes = [16, 8], strides = [1, 1]} : vector<16x32xf32> to vector<16x8xf32>
    %125 = vector.extract_strided_slice %101 {offsets = [0, 24], sizes = [16, 8], strides = [1, 1]} : vector<16x32xf32> to vector<16x8xf32>
    %126 = vector.shape_cast %122 : vector<16x8xf32> to vector<1x16x8xf32>
    %127 = vector.shape_cast %123 : vector<16x8xf32> to vector<1x16x8xf32>
    %128 = vector.shape_cast %124 : vector<16x8xf32> to vector<1x16x8xf32>
    %129 = vector.shape_cast %125 : vector<16x8xf32> to vector<1x16x8xf32>
    %130 = tpu.concatenate %126, %127, %128, %129 in 0 : vector<1x16x8xf32>, vector<1x16x8xf32>, vector<1x16x8xf32>, vector<1x16x8xf32> -> vector<4x16x8xf32>
    %131 = vector.shape_cast %130 : vector<4x16x8xf32> to vector<8x8x8xf32>
    "tpu.trace_start"() <{level = 10 : i32, message = "gqd,gkd->gqk"}> : () -> ()
    %cst_68 = arith.constant dense<0.000000e+00> : vector<8x8x8xf32>
    %132 = tpu.matmul %111, %121, %cst_68 {dimension_numbers = #tpu.dot_dimension_numbers<[2], [2], [1], [1], [0, 0, 0, 1, 1, 1], [0], [0]>} : vector<8x8x8xf32>, vector<8x8x8xf32>, vector<8x8x8xf32> -> vector<8x8x8xf32>
    "tpu.trace_stop"() : () -> ()
    %cst_69 = arith.constant 0.353553385 : f32
    %133 = vector.broadcast %cst_69 : f32 to vector<8x8x8xf32>
    %134 = arith.mulf %132, %133 : vector<8x8x8xf32>
    %cst_70 = arith.constant dense<0xFF800000> : vector<8x8xf32>
    %135 = vector.multi_reduction <maximumf>, %134, %cst_70 [2] : vector<8x8x8xf32> to vector<8x8xf32>
    %136 = vector.shape_cast %135 : vector<8x8xf32> to vector<8x8x1xf32>
    %137 = vector.broadcast %136 : vector<8x8x1xf32> to vector<8x8x8xf32>
    %138 = arith.subf %134, %137 : vector<8x8x8xf32>
    %139 = math.exp %138 : vector<8x8x8xf32>
    %cst_71 = arith.constant dense<0.000000e+00> : vector<8x8xf32>
    %140 = vector.multi_reduction <add>, %139, %cst_71 [2] : vector<8x8x8xf32> to vector<8x8xf32>
    %141 = vector.shape_cast %140 : vector<8x8xf32> to vector<8x8x1xf32>
    %142 = tpu.reciprocal %141 : vector<8x8x1xf32> -> vector<8x8x1xf32>
    %143 = vector.broadcast %142 : vector<8x8x1xf32> to vector<8x8x8xf32>
    %144 = arith.mulf %139, %143 : vector<8x8x8xf32>
    "tpu.trace_start"() <{level = 10 : i32, message = "gqk,gkd->gqd"}> : () -> ()
    %cst_72 = arith.constant dense<0.000000e+00> : vector<8x8x8xf32>
    %145 = tpu.matmul %144, %131, %cst_72 {dimension_numbers = #tpu.dot_dimension_numbers<[2], [1], [1], [2], [0, 0, 0, 1, 1, 2], [0], [0]>} : vector<8x8x8xf32>, vector<8x8x8xf32>, vector<8x8x8xf32> -> vector<8x8x8xf32>
    "tpu.trace_stop"() : () -> ()
    %146 = vector.shape_cast %145 : vector<8x8x8xf32> to vector<4x16x8xf32>
    %147 = vector.extract_strided_slice %146 {offsets = [0, 0, 0], sizes = [1, 16, 8], strides = [1, 1, 1]} : vector<4x16x8xf32> to vector<1x16x8xf32>
    %148 = vector.shape_cast %147 : vector<1x16x8xf32> to vector<16x8xf32>
    %149 = vector.extract_strided_slice %146 {offsets = [1, 0, 0], sizes = [1, 16, 8], strides = [1, 1, 1]} : vector<4x16x8xf32> to vector<1x16x8xf32>
    %150 = vector.shape_cast %149 : vector<1x16x8xf32> to vector<16x8xf32>
    %151 = vector.extract_strided_slice %146 {offsets = [2, 0, 0], sizes = [1, 16, 8], strides = [1, 1, 1]} : vector<4x16x8xf32> to vector<1x16x8xf32>
    %152 = vector.shape_cast %151 : vector<1x16x8xf32> to vector<16x8xf32>
    %153 = vector.extract_strided_slice %146 {offsets = [3, 0, 0], sizes = [1, 16, 8], strides = [1, 1, 1]} : vector<4x16x8xf32> to vector<1x16x8xf32>
    %154 = vector.shape_cast %153 : vector<1x16x8xf32> to vector<16x8xf32>
    %155 = tpu.concatenate %148, %150, %152, %154 in 1 : vector<16x8xf32>, vector<16x8xf32>, vector<16x8xf32>, vector<16x8xf32> -> vector<16x32xf32>
    %c0_73 = arith.constant 0 : index
    %c0_74 = arith.constant 0 : index
    %156 = vector.load %arg6[%c0_73, %c0_74] : memref<32x32xf32, #tpu.memory_space<vmem>>, vector<32x32xf32>
    %cst_75 = arith.constant dense<0.000000e+00> : vector<16x32xf32>
    %157 = tpu.matmul %155, %156, %cst_75 {dimension_numbers = #tpu.dot_dimension_numbers<[1], [0], [0], [1], [0, 0, 1, 1], [], []>} : vector<16x32xf32>, vector<32x32xf32>, vector<16x32xf32> -> vector<16x32xf32>
    %c0_76 = arith.constant 0 : index
    %c0_77 = arith.constant 0 : index
    %158 = vector.load %arg7[%c0_76, %c0_77] : memref<1x32xf32, #tpu.memory_space<vmem>>, vector<1x32xf32>
    %159 = vector.broadcast %158 : vector<1x32xf32> to vector<16x32xf32>
    %160 = arith.addf %157, %159 : vector<16x32xf32>
    %161 = vector.shape_cast %160 : vector<16x32xf32> to vector<2x8x32xf32>
    %162 = vector.broadcast %31 : vector<2x1x32xf32> to vector<2x8x32xf32>
    %163 = arith.mulf %162, %161 : vector<2x8x32xf32>
    %164 = arith.addf %0, %163 : vector<2x8x32xf32>
    %cst_78 = arith.constant dense<0.000000e+00> : vector<2x8xf32>
    %165 = vector.multi_reduction <add>, %164, %cst_78 [2] : vector<2x8x32xf32> to vector<2x8xf32>
    %166 = vector.shape_cast %165 : vector<2x8xf32> to vector<2x8x1xf32>
    %cst_79 = arith.constant 3.200000e+01 : f32
    %167 = vector.broadcast %cst_79 : f32 to vector<2x8x1xf32>
    %168 = arith.divf %166, %167 : vector<2x8x1xf32>
    %169 = vector.broadcast %168 : vector<2x8x1xf32> to vector<2x8x32xf32>
    %170 = arith.subf %164, %169 : vector<2x8x32xf32>
    %171 = arith.mulf %170, %170 : vector<2x8x32xf32>
    %cst_80 = arith.constant dense<0.000000e+00> : vector<2x8xf32>
    %172 = vector.multi_reduction <add>, %171, %cst_80 [2] : vector<2x8x32xf32> to vector<2x8xf32>
    %173 = vector.shape_cast %172 : vector<2x8xf32> to vector<2x8x1xf32>
    %cst_81 = arith.constant 3.200000e+01 : f32
    %174 = vector.broadcast %cst_81 : f32 to vector<2x8x1xf32>
    %175 = arith.divf %173, %174 : vector<2x8x1xf32>
    %176 = vector.broadcast %168 : vector<2x8x1xf32> to vector<2x8x32xf32>
    %177 = arith.subf %164, %176 : vector<2x8x32xf32>
    %cst_82 = arith.constant 9.99999997E-7 : f32
    %178 = vector.broadcast %cst_82 : f32 to vector<2x8x1xf32>
    %179 = arith.addf %175, %178 : vector<2x8x1xf32>
    %180 = math.rsqrt %179 : vector<2x8x1xf32>
    %181 = vector.broadcast %180 : vector<2x8x1xf32> to vector<2x8x32xf32>
    %182 = arith.mulf %177, %181 : vector<2x8x32xf32>
    %cst_83 = arith.constant 1.000000e+00 : f32
    %183 = vector.broadcast %cst_83 : f32 to vector<2x1x32xf32>
    %184 = arith.addf %183, %47 : vector<2x1x32xf32>
    %185 = vector.broadcast %184 : vector<2x1x32xf32> to vector<2x8x32xf32>
    %186 = arith.mulf %182, %185 : vector<2x8x32xf32>
    %187 = vector.broadcast %39 : vector<2x1x32xf32> to vector<2x8x32xf32>
    %188 = arith.addf %186, %187 : vector<2x8x32xf32>
    %189 = vector.shape_cast %188 : vector<2x8x32xf32> to vector<16x32xf32>
    %c0_84 = arith.constant 0 : index
    %c0_85 = arith.constant 0 : index
    %190 = vector.load %arg8[%c0_84, %c0_85] : memref<32x128xf32, #tpu.memory_space<vmem>>, vector<32x128xf32>
    %cst_86 = arith.constant dense<0.000000e+00> : vector<16x128xf32>
    %191 = tpu.matmul %189, %190, %cst_86 {dimension_numbers = #tpu.dot_dimension_numbers<[1], [0], [0], [1], [0, 0, 1, 1], [], []>} : vector<16x32xf32>, vector<32x128xf32>, vector<16x128xf32> -> vector<16x128xf32>
    %c0_87 = arith.constant 0 : index
    %c0_88 = arith.constant 0 : index
    %192 = vector.load %arg9[%c0_87, %c0_88] : memref<1x128xf32, #tpu.memory_space<vmem>>, vector<1x128xf32>
    %193 = vector.broadcast %192 : vector<1x128xf32> to vector<16x128xf32>
    %194 = arith.addf %191, %193 : vector<16x128xf32>
    %cst_89 = arith.constant 5.000000e-01 : f32
    %195 = vector.broadcast %cst_89 : f32 to vector<16x128xf32>
    %196 = arith.mulf %195, %194 : vector<16x128xf32>
    %cst_90 = arith.constant 4.471500e-02 : f32
    %197 = vector.broadcast %cst_90 : f32 to vector<16x128xf32>
    %198 = arith.mulf %197, %194 : vector<16x128xf32>
    %199 = arith.mulf %198, %194 : vector<16x128xf32>
    %200 = arith.mulf %199, %194 : vector<16x128xf32>
    %201 = arith.addf %194, %200 : vector<16x128xf32>
    %cst_91 = arith.constant 0.797884583 : f32
    %202 = vector.broadcast %cst_91 : f32 to vector<16x128xf32>
    %203 = arith.mulf %202, %201 : vector<16x128xf32>
    %204 = math.tanh %203 : vector<16x128xf32>
    %cst_92 = arith.constant 1.000000e+00 : f32
    %205 = vector.broadcast %cst_92 : f32 to vector<16x128xf32>
    %206 = arith.addf %205, %204 : vector<16x128xf32>
    %207 = arith.mulf %196, %206 : vector<16x128xf32>
    %c0_93 = arith.constant 0 : index
    %c0_94 = arith.constant 0 : index
    %208 = vector.load %arg10[%c0_93, %c0_94] : memref<128x32xf32, #tpu.memory_space<vmem>>, vector<128x32xf32>
    %cst_95 = arith.constant dense<0.000000e+00> : vector<16x32xf32>
    %209 = tpu.matmul %207, %208, %cst_95 {dimension_numbers = #tpu.dot_dimension_numbers<[1], [0], [0], [1], [0, 0, 1, 1], [], []>} : vector<16x128xf32>, vector<128x32xf32>, vector<16x32xf32> -> vector<16x32xf32>
    %c0_96 = arith.constant 0 : index
    %c0_97 = arith.constant 0 : index
    %210 = vector.load %arg11[%c0_96, %c0_97] : memref<1x32xf32, #tpu.memory_space<vmem>>, vector<1x32xf32>
    %211 = vector.broadcast %210 : vector<1x32xf32> to vector<16x32xf32>
    %212 = arith.addf %209, %211 : vector<16x32xf32>
    %213 = vector.shape_cast %212 : vector<16x32xf32> to vector<2x8x32xf32>
    %214 = vector.broadcast %55 : vector<2x1x32xf32> to vector<2x8x32xf32>
    %215 = arith.mulf %214, %213 : vector<2x8x32xf32>
    %216 = arith.addf %164, %215 : vector<2x8x32xf32>
    %c0_98 = arith.constant 0 : index
    %c0_99 = arith.constant 0 : index
    %c0_100 = arith.constant 0 : index
    %217 = vector.load %arg12[%c0_98, %c0_99, %c0_100] : memref<2x8x32xf32, #tpu.memory_space<vmem>>, vector<2x8x32xf32>
    tpu.vector_store %arg12[%c0_98, %c0_99, %c0_100], %216 {strides = array<i32>} : memref<2x8x32xf32, #tpu.memory_space<vmem>>, vector<2x8x32xf32>,
    return
  }
}

</mosaic_0001>

<bundles_post_ra>
// kernel: tpu_custom_call.1
= control target key start
LH: loop header
LB: loop body
LE: loop exit
PB: predicated region body
PF: predicated region fallthrough
CT: control target
= control target key end

     0   :  { %17 = vsyncpa [#allocation3], 0  ;;  %s4126_s0 = inlined_call_operand.hbm [shape: f32[2,8,32], index: 0, kind: input, shape index: {}]   ;;  %s4127_s1 = inlined_call_operand.vmem [shape: f32[2,32], index: 1, kind: input, shape index: {}]   ;;  %s4128_s2 = inlined_call_operand.hbm [shape: f32[6,32,32], index: 2, kind: input, shape index: {}]   ;;  %s4129_s3 = inlined_call_operand.hbm [shape: f32[6,1,32], index: 3, kind: input, shape index: {}]   ;;  %s4130_s4 = inlined_call_operand.vmem [shape: f32[3,32,32], index: 4, kind: input, shape index: {}]   ;;  %s4131_s5 = inlined_call_operand.vmem [shape: f32[3,1,32], index: 5, kind: input, shape index: {}]   ;;  %s4132_s6 = inlined_call_operand.vmem [shape: f32[32,32], index: 6, kind: input, shape index: {}]   ;;  %s4133_s7 = inlined_call_operand.hbm [shape: f32[1,32], index: 7, kind: input, shape index: {}]   ;;  %s4134_s8 = inlined_call_operand.vmem [shape: f32[32,128], index: 8, kind: input, shape index: {}]   ;;  %s4135_s9 = inlined_call_operand.hbm [shape: f32[1,128], index: 9, kind: input, shape index: {}]   ;;  %s4136_s10 = inlined_call_operand.vmem [shape: f32[128,32], index: 10, kind: input, shape index: {}]   ;;  %s4137_s11 = inlined_call_operand.vmem [shape: f32[1,32], index: 11, kind: input, shape index: {}]   ;;  %s4138_s12 = inlined_call_operand.hbm [shape: f32[2,8,32], index: 12, kind: output, shape index: {}]  }
   0x1   :  { %18 = vsyncpa [#allocation6], 0 }
   0x2   :  { %19 = vsyncpa [#allocation9], 0 }
   0x3   :  { %20 = vsyncpa [#allocation4], 0  ;;  %s3560_s21 = smov [#allocation5]   ;;  %s3561_s23 = smov [#allocation8]  }
   0x4   :  { %s40_s22 = sshll.u32 %s3560_s21, 4  ;;  %s71_s24 = sshll.u32 %s3561_s23, 4  ;;  %s41_s22 = int_to_ptr.vmem [resolvable:$true] %s40_s22  ;;  %s3643_s24 = int_to_ptr.vmem [resolvable:$true] %s71_s24 }
   0x5   :  { %s3420_s27 = scalar_lea.hbm %s4128_s2, 3072 }
   0x6   :  { %p3421_p0 = scmp.ne.s32.totalorder %s4128_s2, %s3420_s27  ;;  %p3424_p1 = scmp.lt.u32.totalorder %s3420_s27, %s4128_s2 }
   0x8   :  { %p3426_p2 = pnand %p3424_p1, %p3421_p0 }
   0xa   :  { %3429 = shalt.err (!%p3426_p2)
}
   0xb   :  { %s3430_s14 = scalar_lea.vmem %s41_s22, 3072  ;;  %p3435_p4 = scmp.lt.s32.totalorder %s41_s22, %s41_s22 }
   0xc   :  { %p3431_p3 = scmp.ne.s32.totalorder %s41_s22, %s3430_s14  ;;  %p3436_p5 = scmp.lt.s32.totalorder %s3430_s14, %s3430_s14 }
   0xe   :  { %p3437_p6 = por %p3436_p5, %p3435_p4 }
  0x10   :  { %p3438_p7 = pnand %p3437_p6, %p3431_p3 }
  0x12   :  { %3441 = shalt.err (!%p3438_p7)
}
  0x13   :  { %s3562_s15 = smov 128   ;;  %s3563_s16 = smov 8  }
  0x14   :  { %46 = dma.hbm_to_vmem [thread:$0]  %s4128_s2, 3072, %s41_s22, [#allocation6], %s3562_s15, %s3562_s15, %s3563_s16  }
  0x15   :  { %s3442_s21 = scalar_lea.hbm %s4133_s7, 16 }
  0x16   :  { %p3443_p8 = scmp.ne.s32.totalorder %s4133_s7, %s3442_s21  ;;  %p3446_p9 = scmp.lt.u32.totalorder %s3442_s21, %s4133_s7 }
  0x18   :  { %p3448_p10 = pnand %p3446_p9, %p3443_p8 }
  0x1a   :  { %3451 = shalt.err (!%p3448_p10)
}
  0x1b   :  { %s3452_s28 = scalar_lea.vmem %s3643_s24, 16  ;;  %s3456_s2 = scalar_lea.vmem %s3643_s24, 32 }
  0x1c   :  { %p3453_p11 = scmp.ne.s32.totalorder %s3643_s24, %s3452_s28  ;;  %p3457_p12 = scmp.lt.s32.totalorder %s3643_s24, %s3643_s24 }
  0x1d   :  { %p3458_p13 = scmp.lt.s32.totalorder %s3456_s2, %s3452_s28 }
  0x1f   :  { %p3459_p0 = por %p3458_p13, %p3457_p12 }
  0x21   :  { %p3460_p1 = pnand %p3459_p0, %p3453_p11 }
  0x23   :  { %3463 = shalt.err (!%p3460_p1)
}
  0x24   :  { %74 = dma.hbm_to_vmem [thread:$0]  %s4133_s7, 16, %s3643_s24, [#allocation9]  }
  0x25   :  { %s3564_s30 = smov [#allocation2]   ;;  %s3565_s14 = smov [#allocation7]  }
  0x26   :  { %s26_s13 = sshll.u32 %s3564_s30, 4  ;;  %s52_s17 = sshll.u32 %s3565_s14, 4  ;;  %s27_s13 = int_to_ptr.vmem [resolvable:$true] %s26_s13  ;;  %s3678_s17 = int_to_ptr.vmem [resolvable:$true] %s52_s17 }
  0x27   :  { %s3464_s20 = scalar_lea.hbm %s4126_s0, 256 }
  0x28   :  { %p3465_p2 = scmp.ne.s32.totalorder %s4126_s0, %s3464_s20  ;;  %p3468_p3 = scmp.lt.u32.totalorder %s3464_s20, %s4126_s0 }
  0x2a   :  { %p3470_p4 = pnand %p3468_p3, %p3465_p2 }
  0x2c   :  { %3473 = shalt.err (!%p3470_p4)
}
  0x2d   :  { %s3474_s7 = scalar_lea.vmem %s27_s13, 256  ;;  %p3479_p6 = scmp.lt.s32.totalorder %s27_s13, %s27_s13 }
  0x2e   :  { %p3475_p5 = scmp.ne.s32.totalorder %s27_s13, %s3474_s7  ;;  %p3480_p7 = scmp.lt.s32.totalorder %s3474_s7, %s3474_s7 }
  0x30   :  { %p3481_p8 = por %p3480_p7, %p3479_p6 }
  0x32   :  { %p3482_p9 = pnand %p3481_p8, %p3475_p5 }
  0x34   :  { %3485 = shalt.err (!%p3482_p9)
}
  0x35   :  { %32 = dma.hbm_to_vmem [thread:$0]  %s4126_s0, 256, %s27_s13, [#allocation3], %s3562_s15, %s3562_s15, %s3563_s16  }
  0x36   :  { %s3486_s22 = scalar_lea.hbm %s4129_s3, 96 }
  0x37   :  { %p3487_p10 = scmp.ne.s32.totalorder %s4129_s3, %s3486_s22  ;;  %p3490_p11 = scmp.lt.u32.totalorder %s3486_s22, %s4129_s3 }
  0x39   :  { %p3492_p12 = pnand %p3490_p11, %p3487_p10 }
  0x3b   :  { %3495 = shalt.err (!%p3492_p12)
}
  0x3c   :  { %s3496_s19 = scalar_lea.vmem %s3678_s17, 96  ;;  %p3501_p0 = scmp.lt.s32.totalorder %s3678_s17, %s3678_s17 }
  0x3d   :  { %p3497_p13 = scmp.ne.s32.totalorder %s3678_s17, %s3496_s19  ;;  %p3502_p1 = scmp.lt.s32.totalorder %s3496_s19, %s3496_s19 }
  0x3f   :  { %p3503_p2 = por %p3502_p1, %p3501_p0 }
  0x41   :  { %p3504_p3 = pnand %p3503_p2, %p3497_p13 }
  0x43   :  { %3507 = shalt.err (!%p3504_p3)
}
  0x44   :  { %s3566_s0 = smov 16   ;;  %s3567_s13 = smov 1  }
  0x45   :  { %58 = dma.hbm_to_vmem [thread:$0]  %s4129_s3, 96, %s3678_s17, [#allocation6], %s3566_s0, %s3566_s0, %s3567_s13  }
  0x46   :  { %s3568_s23 = smov [#allocation10]   ;;  %s3508_s24 = scalar_lea.hbm %s4135_s9, 16 }
  0x47   :  { %s83_s25 = sshll.u32 %s3568_s23, 4  ;;  %p3509_p4 = scmp.ne.s32.totalorder %s4135_s9, %s3508_s24  ;;  %s84_s25 = int_to_ptr.vmem [resolvable:$true] %s83_s25 }
  0x48   :  { %p3512_p5 = scmp.lt.u32.totalorder %s3508_s24, %s4135_s9 }
  0x4a   :  { %p3514_p6 = pnand %p3512_p5, %p3509_p4 }
  0x4c   :  { %3517 = shalt.err (!%p3514_p6)
}
  0x4d   :  { %s3518_s29 = scalar_lea.vmem %s84_s25, 16  ;;  %s3522_s3 = scalar_lea.vmem %s84_s25, 32 }
  0x4e   :  { %p3519_p7 = scmp.ne.s32.totalorder %s84_s25, %s3518_s29  ;;  %p3523_p8 = scmp.lt.s32.totalorder %s84_s25, %s84_s25 }
  0x4f   :  { %p3524_p9 = scmp.lt.s32.totalorder %s3522_s3, %s3518_s29 }
  0x51   :  { %p3525_p10 = por %p3524_p9, %p3523_p8 }
  0x53   :  { %p3526_p11 = pnand %p3525_p10, %p3519_p7 }
  0x55   :  { %3529 = shalt.err (!%p3526_p11)
}
  0x56   :  { %86 = dma.hbm_to_vmem [thread:$0]  %s4135_s9, 16, %s84_s25, [#allocation9]  }
  0x57   :  { %3552 = dma.done.wait [#allocation3], 256  }
  0x58   :  { %3553 = vsyncadd [#allocation3], 4294967040 }
  0x59   :  { %3554 = dma.done.wait [#allocation6], 3168  }
  0x5a   :  { %3555 = vsyncadd [#allocation6], 4294964128 }
  0x5b   :  { %3556 = dma.done.wait [#allocation9], 32  }
  0x5c   :  { %3557 = vsyncadd [#allocation9], 4294967264  ;;  %v3569_v0 = vmov 0.0|0.0   ;;  %vm3570_vm0 = vmmov 0   ;;  %v3571_v1 = vmov 0.0   ;;  %vm127_vm1 = vcmask 261120  }
  0x5d   :  { %3246 = vmatprep.subr.bf16.mxu1 %v3569_v0  ;;  %3018 = vmatprep.mubr.msk.f32.mxu1 %vm3570_vm0, %v3571_v1  ;;  %v3732_v2 = vld [vmem:[#allocation2] sm:$0xff]  ;;  %v3734_v3 = vld [vmem:[#allocation2 + $0x8] sm:$0xff]  ;;  %v116_v4 = vld [vmem:[#allocation5] sm:$0xff]  ;;  %vm1129_vm2 = vcmask 64512   ;;  %s3573_s23 = smov 120   ;;  %s3574_s25 = smov 112  }
  0x5e   :  { %3270 = vmatprep.subr.bf16.mxu0 %v3569_v0  ;;  %3062 = vmatprep.mubr.msk.f32.mxu0 %vm3570_vm0, %v3571_v1  ;;  %v758_v5 = vsel %vm127_vm1, %v3732_v2, 0.0  ;;  %v117_v6 = vld [vmem:[#allocation5 + $0x8] sm:$0xff]  ;;  %v118_v7 = vld [vmem:[#allocation5 + $0x10] sm:$0xff]  ;;  %v119_v8 = vld [vmem:[#allocation5 + $0x18] sm:$0xff]  ;;  %v761_v11 = vsel %vm127_vm1, %v3734_v3, 0.0  ;;  %s3575_s26 = smov 104  }
  0x5f   :  { %759 = vadd.xlane.f32.xlu0 %v758_v5  ;;  %v3247_v9 = vpack.c.bf16 %v117_v6, %v116_v4  ;;  %v108_v10 = vld [vmem:[%s4127_s1] sm:$0x3]  ;;  %v3250_v13 = vpack.c.bf16 %v119_v8, %v118_v7  ;;  %v225_v16 = vld [vmem:[#allocation5 + $0x20] sm:$0xff]  ;;  %v226_v17 = vld [vmem:[#allocation5 + $0x28] sm:$0xff]  ;;  %s3576_s30 = smov 24   ;;  %vm2428_vm3 = vcmask 130048  }
  0x60   :  { %v2837_v12 = vmul.f32 -1.442695, %v108_v10  ;;  %v3253_v19 = vpack.c.bf16 %v226_v17, %v225_v16  ;;  %v227_v21 = vld [vmem:[#allocation5 + $0x30] sm:$0xff]  ;;  %v228_v22 = vld [vmem:[#allocation5 + $0x38] sm:$0xff]  ;;  %v333_v24 = vld [vmem:[#allocation5 + $0x40] sm:$0xff]  ;;  %vm2431_vm4 = vcmask 195584  }
  0x61   :  { %3248 = vmatpush3.bf16.msra.mxu1 %v3247_v9  ;;  %v3256_v23 = vpack.c.bf16 %v228_v22, %v227_v21  ;;  %v334_v25 = vld [vmem:[#allocation5 + $0x48] sm:$0xff]  ;;  %v335_v27 = vld [vmem:[#allocation5 + $0x50] sm:$0xff]  ;;  %v336_v28 = vld [vmem:[#allocation5 + $0x58] sm:$0xff]  ;;  %s3577_s7 = smov [#allocation11]  }
  0x62   :  { %3249 = vmatprep.subr.bf16.mxu1 %v3569_v0  ;;  %3372 = vpow2.f32 %v2837_v12  ;;  %v3259_v26 = vpack.c.bf16 %v334_v25, %v333_v24  ;;  %v3262_v29 = vpack.c.bf16 %v336_v28, %v335_v27  ;;  %v439_v40 = vld [vmem:[#allocation5 + $0x60] sm:$0xff]  ;;  %v440_v41 = vld [vmem:[#allocation5 + $0x68] sm:$0xff]  ;;  %v441_v43 = vld [vmem:[#allocation5 + $0x70] sm:$0xff]  ;;  %s2823_s24 = sshll.u32 %s3577_s7, 4  ;;  %s2824_s24 = int_to_ptr.vmem [resolvable:$true] %s2823_s24 }
  0x63   :  { %762 = vadd.xlane.f32.xlu0 %v761_v11  ;;  %v3265_v42 = vpack.c.bf16 %v440_v41, %v439_v40  ;;  %v442_v44 = vld [vmem:[#allocation5 + $0x78] sm:$0xff]  ;;  %v545_v46 = vld [vmem:[#allocation5 + $0x80] sm:$0xff]  ;;  %v546_v47 = vld [vmem:[#allocation5 + $0x88] sm:$0xff]  ;;  %p3535_p13 = scmp.lt.s32.totalorder %s2824_s24, %s2824_s24 }
  0x64   :  { %v3268_v45 = vpack.c.bf16 %v442_v44, %v441_v43  ;;  %v3271_v48 = vpack.c.bf16 %v546_v47, %v545_v46  ;;  %v653_v49 = vld [vmem:[#allocation5 + $0xa0] sm:$0xff]  ;;  %v654_v50 = vld [vmem:[#allocation5 + $0xa8] sm:$0xff]  ;;  %v547_v52 = vld [vmem:[#allocation5 + $0x90] sm:$0xff] }
  0x65   :  { %3251 = vmatpush3.bf16.msra.mxu1 %v3250_v13  ;;  %v3277_v51 = vpack.c.bf16 %v654_v50, %v653_v49  ;;  %v548_v53 = vld [vmem:[#allocation5 + $0x98] sm:$0xff]  ;;  %v655_v55 = vld [vmem:[#allocation5 + $0xb0] sm:$0xff]  ;;  %v816_v4 = vld [vmem:[%s4130_s4 + $0x18] sm:$0xff] }
  0x66   :  { %3252 = vmatprep.subr.bf16.mxu1 %v3569_v0  ;;  %3272 = vmatpush3.bf16.msra.mxu0 %v3271_v48  ;;  %v3274_v54 = vpack.c.bf16 %v548_v53, %v547_v52  ;;  %v656_v56 = vld [vmem:[#allocation5 + $0xb8] sm:$0xff]  ;;  %v813_v58 = vld [vmem:[%s4130_s4] sm:$0xff]  ;;  %v2855_v6 = vld [vmem:[%s4130_s4 + $0x30] sm:$0xff] }
  0x67   :  { %3273 = vmatprep.subr.bf16.mxu0 %v3569_v0  ;;  %v3280_v57 = vpack.c.bf16 %v656_v56, %v655_v55  ;;  %v814_v59 = vld [vmem:[%s4130_s4 + $0x8] sm:$0xff]  ;;  %v2853_v61 = vld [vmem:[%s4130_s4 + $0x20] sm:$0xff]  ;;  %v2856_v7 = vld [vmem:[%s4130_s4 + $0x38] sm:$0xff] }
  0x68   :  { %v3282_v60 = vpack.c.bf16 %v814_v59, %v813_v58  ;;  %v2854_v62 = vld [vmem:[%s4130_s4 + $0x28] sm:$0xff]  ;;  %v3294_v8 = vpack.c.bf16 %v2856_v7, %v2855_v6  ;;  %v2861_v9 = vld [vmem:[%s4130_s4 + $0x40] sm:$0xff]  ;;  %v2840_v21 = vld [vmem:[#allocation7 + $0x1] ss:$0 sm:$0xff] }
  0x69   :  { %v3290_v63 = vpack.c.bf16 %v2854_v62, %v2853_v61  ;;  %v2863_v56 = vld [vmem:[%s4130_s4 + $0x50] sm:$0xff] }
  0x6a   :  { %3275 = vmatpush3.bf16.msra.mxu0 %v3274_v54 }
  0x6b   :  { %3283 = vmatprep.subr.bf16.mxu0 %v3282_v60 }
  0x6c   :  { %v3373_v14 = vpop.eup %3372 }
  0x6d   :  { %v112_v15 = vadd.f32 1.0, %v3373_v14 }
  0x6f   :  { %3374 = vrcp.f32 %v112_v15 }
  0x79   :  { %v3375_v18 = vpop.eup %3374 }
  0x7a   :  { %v3745_v20 = vmul.f32 %v3375_v18, %v108_v10  ;;  %v2862_v10 = vld [vmem:[%s4130_s4 + $0x48] sm:$0xff]  ;;  %v3572_v18 = vmov 1966171168  }
  0x7b   :  { %v3298_v11 = vpack.c.bf16 %v2862_v10, %v2861_v9 }
  0x7c   :  { %3019 = vmatmul.mubr.msk.f32.vlgmr.msra.gmra.mrb[0].mxu1 %vm127_vm1, %v3745_v20  ;;  %3063 = vmatmul.mubr.msk.f32.vlgmr.msra.gmra.mrb[0].mxu0 %vm127_vm1, %v3745_v20 }
  0x7d   :  { %3254 = vmatpush3.bf16.msra.mxu1 %v3253_v19  ;;  %3029 = vmatprep.mubr.msk.f32.mxu1 %vm3570_vm0, %v3571_v1  ;;  %v203_v19 = vunpack.c.l.s4 %v3572_v18 }
  0x7e   :  { %3255 = vmatprep.subr.bf16.mxu1 %v3569_v0  ;;  %3285 = vmatpush3.bf16.msra.mxu0 %v3282_v60 }
  0x7f   :  { %v204_v22 = vunpack.c.0.s8 %v203_v19 }
  0x81   :  { %3257 = vmatpush3.bf16.msra.mxu1 %v3256_v23 }
  0x82   :  { %3258 = vmatprep.subr.bf16.mxu1 %v3569_v0 }
  0x84   :  { %3030 = vmatmul.mubr.msk.f32.vlgmr.msra.gmra.mrb[2].mxu1 %vm127_vm1, %v3745_v20 }
  0x85   :  { %3260 = vmatpush3.bf16.msra.mxu1 %v3259_v26  ;;  %3040 = vmatprep.mubr.msk.f32.mxu1 %vm3570_vm0, %v3571_v1 }
  0x86   :  { %3261 = vmatprep.subr.bf16.mxu1 %v3569_v0 }
  0x89   :  { %3263 = vmatpush3.bf16.msra.mxu1 %v3262_v29 }
  0x8a   :  { %3264 = vmatprep.subr.bf16.mxu1 %v3569_v0 }
  0x8c   :  { %3041 = vmatmul.mubr.msk.f32.vlgmr.msra.gmra.mrb[4].mxu1 %vm127_vm1, %v3745_v20 }
  0x8d   :  { %3051 = vmatprep.mubr.msk.f32.mxu1 %vm3570_vm0, %v3571_v1  ;;  %3266 = vmatpush3.bf16.msra.mxu1 %v3265_v42 }
  0x8e   :  { %3267 = vmatprep.subr.bf16.mxu1 %v3569_v0 }
  0x91   :  { %3269 = vmatpush3.bf16.msra.mxu1 %v3268_v45 }
  0x92   :  { %3276 = vmatprep.subr.bf16.mxu1 %v3569_v0 }
  0x94   :  { %3052 = vmatmul.mubr.msk.f32.vlgmr.msra.gmra.mrb[6].mxu1 %vm127_vm1, %v3745_v20 }
  0x95   :  { %3278 = vmatpush3.bf16.msra.mxu1 %v3277_v51  ;;  %3073 = vmatprep.mubr.msk.f32.mxu1 %vm3570_vm0, %v3571_v1 }
  0x96   :  { %3279 = vmatprep.subr.bf16.mxu1 %v3569_v0  ;;  %v815_v0 = vld [vmem:[%s4130_s4 + $0x10] sm:$0xff] }
  0x97   :  { %v3286_v5 = vpack.c.bf16 %v816_v4, %v815_v0 }
  0x99   :  { %3281 = vmatpush3.bf16.msra.mxu1 %v3280_v57  ;;  %3287 = vmatprep.subr.bf16.mxu0 %v3286_v5  ;;  %v2864_v57 = vld [vmem:[%s4130_s4 + $0x58] sm:$0xff] }
  0x9a   :  { %3291 = vmatprep.subr.bf16.mxu1 %v3290_v63  ;;  %3289 = vmatpush3.bf16.msra.mxu0 %v3286_v5  ;;  %v3302_v60 = vpack.c.bf16 %v2864_v57, %v2863_v56  ;;  %v2858_v5 = vld [vmem:[%s4131_s5 + $0x1] ss:$0 sm:$0xff] }
  0x9b   :  { %3299 = vmatprep.subr.bf16.mxu0 %v3298_v11 }
  0x9c   :  { %3074 = vmatmul.mubr.msk.f32.vlgmr.msra.gmra.mrb[8].mxu1 %vm127_vm1, %v3745_v20  ;;  %v205_v20 = vlaneseq }
  0x9d   :  { %3293 = vmatpush3.bf16.msra.mxu1 %v3290_v63 }
  0x9e   :  { %3295 = vmatprep.subr.bf16.mxu1 %v3294_v8  ;;  %v206_v23 = vshrl.u32 %v205_v20, 7 }
  0xa0   :  { %v3820_v26 = vsub.s32 %v204_v22, %v206_v23  ;;  %v3826_v42 = vsub.s32 0, %v206_v23 }
  0xa1   :  { %3297 = vmatpush3.bf16.msra.mxu1 %v3294_v8 }
  0xa2   :  { %3109 = vmatprep.subr.mxu1 %v3571_v1 }
  0xec   :  { %v760_v30 = vpop.xlane.xlu0 %759 }
  0xed   :  { %v765_v31 = vmul.f32 0.03125, %v760_v30  ;;  %v2838_v30 = vld [vmem:[#allocation7] ss:$0 sm:$0xff] }
  0xef   :  { %v3764_v32 = vsub.f32 %v3732_v2, %v765_v31 }
  0xf0   :  { %v763_v33 = vpop.xlane.xlu0 %762 }
  0xf1   :  { %v766_v34 = vmul.f32 0.03125, %v763_v33  ;;  %v769_v35 = vmul.f32 %v3764_v32, %v3764_v32 }
  0xf3   :  { %v3769_v36 = vsub.f32 %v3734_v3, %v766_v34  ;;  %v771_v37 = vsel %vm127_vm1, %v769_v35, 0.0 }
  0xf4   :  { %772 = vadd.xlane.f32.xlu1 %v771_v37 }
  0xf5   :  { %v770_v38 = vmul.f32 %v3769_v36, %v3769_v36 }
  0xf7   :  { %v774_v39 = vsel %vm127_vm1, %v770_v38, 0.0 }
  0xf8   :  { %775 = vadd.xlane.f32.xlu1 %v774_v39 }
 0x14f   :  { %v197_v12 = vpop.f32.mrb[0].mxu1  ;;  %v3855_v62 = vpop.f32.mrb[0].mxu0 }
 0x150   :  { %v3020_v13 = vpop.f32.mrb[1].mxu1  ;;  %v198_v34 = vadd.f32 %v2838_v30, %v197_v12  ;;  %v3064_v0 = vpop.f32.mrb[1].mxu0 }
 0x152   :  { %v208_v39 = vrot.slane %v198_v34, %v3820_v26 }
 0x154   :  { %v209_v43 = vcombine.high %v208_v39, %v208_v39  ;;  %v216_v44 = vrot.slane %v208_v39, %v3820_v26 }
 0x156   :  { %v223_v49 = vrot.slane %v209_v43, %v3820_v26  ;;  %v804_v50 = vrot.slane %v216_v44, %v3826_v42 }
 0x157   :  { %v303_v14 = vpop.f32.mrb[2].mxu1 }
 0x158   :  { %v3031_v15 = vpop.f32.mrb[3].mxu1  ;;  %v304_v24 = vadd.f32 %v2840_v21, %v303_v14 }
 0x15a   :  { %v314_v28 = vrot.slane %v304_v24, %v3820_v26 }
 0x15c   :  { %v315_v35 = vcombine.high %v314_v28, %v314_v28  ;;  %v322_v37 = vrot.slane %v314_v28, %v3820_v26  ;;  %v2866_v28 = vld [vmem:[%s4131_s5 + $0x2] ss:$0 sm:$0xff] }
 0x15e   :  { %v329_v40 = vrot.slane %v315_v35, %v3820_v26  ;;  %v785_v41 = vadd.f32 1.0, %v322_v37 }
 0x15f   :  { %v3818_v16 = vpop.f32.mrb[4].mxu1 }
 0x160   :  { %v3042_v17 = vpop.f32.mrb[5].mxu1  ;;  %v786_v45 = vadd.f32 1.0, %v329_v40  ;;  %v792_v46 = vrot.slane %v785_v41, %v3826_v42 }
 0x162   :  { %v796_v51 = vrot.slane %v786_v45, %v3826_v42 }
 0x181   :  { %v773_v25 = vpop.xlane.xlu1 %772 }
 0x182   :  { %v777_v27 = vmul.f32 0.03125, %v773_v25 }
 0x184   :  { %v779_v29 = vadd.f32 1e-06, %v777_v27 }
 0x185   :  { %v776_v31 = vpop.xlane.xlu1 %775 }
 0x186   :  { %3376 = vrsqrt.f32 %v779_v29  ;;  %v778_v33 = vmul.f32 0.03125, %v776_v31 }
 0x188   :  { %v780_v38 = vadd.f32 1e-06, %v778_v33 }
 0x18a   :  { %3378 = vrsqrt.f32 %v780_v38 }
 0x190   :  { %v3377_v47 = vpop.eup %3376 }
 0x191   :  { %v783_v48 = vmul.f32 %v3377_v47, %v3764_v32  ;;  %v808_v32 = vrot.slane %v223_v49, %v3826_v42 }
 0x193   :  { %v799_v52 = vmul.f32 %v792_v46, %v783_v48 }
 0x194   :  { %v3379_v53 = vpop.eup %3378 }
 0x195   :  { %v784_v54 = vmul.f32 %v3379_v53, %v3769_v36  ;;  %v811_v55 = vadd.f32 %v804_v50, %v799_v52  ;;  %v3853_v36 = vpop.f32.mrb[6].mxu1 }
 0x196   :  { %v3053_v61 = vpop.f32.mrb[7].mxu1 }
 0x197   :  { %v800_v58 = vmul.f32 %v796_v51, %v784_v54  ;;  %3084 = vmatprep.mubr.msk.f32.mxu0 %vm127_vm1, %v811_v55  ;;  %3095 = vmatprep.mubr.msk.f32.mxu1 %vm127_vm1, %v811_v55  ;;  %v3857_v63 = vpop.f32.mrb[8].mxu1 }
 0x198   :  { %v3075_v4 = vpop.f32.mrb[9].mxu1 }
 0x199   :  { %v812_v59 = vadd.f32 %v808_v32, %v800_v58 }
 0x19b   :  { %3085 = vmatmul.mubr.msk.f32.vlgmr.msra.gmra.mrb[2].mxu0 %vm127_vm1, %v812_v59  ;;  %3096 = vmatmul.mubr.msk.f32.vlgmr.msra.gmra.mrb[10].mxu1 %vm127_vm1, %v812_v59 }
 0x19c   :  { %3301 = vmatpush3.bf16.msra.mxu0 %v3298_v11  ;;  %3106 = vmatprep.mubr.msk.f32.mxu0 %vm127_vm1, %v811_v55  ;;  %v2850_v11 = vld [vmem:[%s4131_s5] ss:$0 sm:$0xff] }
 0x19d   :  { %3303 = vmatprep.subr.bf16.mxu0 %v3302_v60  ;;  %3111 = vmatprep.mubr.msk.f32.mxu1 %vm3570_vm0, %v3571_v1 }
 0x1a0   :  { %3305 = vmatpush3.bf16.msra.mxu0 %v3302_v60 }
 0x1a1   :  { %3119 = vmatprep.subr.mxu0 %v3571_v1 }
 0x1a3   :  { %3107 = vmatmul.mubr.msk.f32.vlgmr.msra.gmra.mrb[4].mxu0 %vm127_vm1, %v812_v59 }
 0x1a4   :  { %3121 = vmatprep.mubr.msk.f32.mxu0 %vm3570_vm0, %v3571_v1 }
 0x26e   :  { %v3086_v6 = vpop.f32.mrb[2].mxu0  ;;  %v3097_v7 = vpop.f32.mrb[10].mxu1 }
 0x26f   :  { %v990_v8 = vadd.f32 %v3097_v7, %v2858_v5  ;;  %v896_v9 = vpop.f32.mrb[3].mxu0  ;;  %v984_v10 = vpop.f32.mrb[11].mxu1  ;;  %v902_v13 = vadd.f32 %v3086_v6, %v2850_v11 }
 0x270   :  { %v985_v12 = vadd.f32 %v2858_v5, %v984_v10  ;;  %v897_v14 = vadd.f32 %v2850_v11, %v896_v9 }
 0x271   :  { %1099 = vrot.lane.b32.xlu1 %v990_v8, %s3573_s23 }
 0x272   :  { %1097 = vrot.lane.b32.xlu0 %v985_v12, %s3573_s23  ;;  %3110 = vmatpush3.xpose.msk.msra.mxu1 %vm1129_vm2, %v985_v12 }
 0x273   :  { %3114 = vmatprep.subr.mxu1 %v3571_v1 }
 0x275   :  { %1085 = vrot.lane.b32.xlu1 %v902_v13, %s3573_s23  ;;  %3112 = vmatmul.mubr.msk.f32.vlgmr.msra.gmra.mrb[12].mxu1 %vm1129_vm2, %v897_v14 }
 0x276   :  { %v3108_v15 = vpop.f32.mrb[4].mxu0  ;;  %1101 = vrot.lane.b32.xlu0 %v985_v12, %s3574_s25  ;;  %3115 = vmatpush3.xpose.msk.msra.mxu1 %vm1129_vm2, %v990_v8 }
 0x277   :  { %v1072_v17 = vpop.f32.mrb[5].mxu0  ;;  %3116 = vmatprep.mubr.msk.f32.mxu1 %vm3570_vm0, %v3571_v1  ;;  %3124 = vmatprep.subr.mxu1 %v3571_v1  ;;  %v3921_v33 = vadd.f32 %v3108_v15, %v2866_v28 }
 0x278   :  { %v3912_v29 = vadd.f32 %v2866_v28, %v1072_v17 }
 0x279   :  { %1103 = vrot.lane.b32.xlu1 %v990_v8, %s3574_s25  ;;  %3117 = vmatmul.mubr.msk.f32.vlgmr.msra.gmra.mrb[14].mxu1 %vm1129_vm2, %v902_v13 }
 0x27a   :  { %1087 = vrot.lane.b32.xlu0 %v897_v14, %s3574_s25  ;;  %3126 = vmatprep.mubr.msk.f32.mxu1 %vm3570_vm0, %v3571_v1 }
 0x27d   :  { %1083 = vrot.lane.b32.xlu1 %v897_v14, %s3573_s23 }
 0x27e   :  { %1105 = vrot.lane.b32.xlu0 %v985_v12, %s3575_s26 }
 0x281   :  { %1089 = vrot.lane.b32.xlu1 %v902_v13, %s3574_s25 }
 0x282   :  { %1091 = vrot.lane.b32.xlu0 %v897_v14, %s3575_s26 }
 0x285   :  { %1107 = vrot.lane.b32.xlu1 %v990_v8, %s3575_s26 }
 0x289   :  { %1093 = vrot.lane.b32.xlu1 %v902_v13, %s3575_s26 }
 0x2e3   :  { %v1100_v18 = vpop.permute.xlu1 %1099 }
 0x2e4   :  { %v1098_v19 = vpop.permute.xlu0 %1097  ;;  %3125 = vmatpush3.xpose.msk.msra.mxu1 %vm1129_vm2, %v1100_v18 }
 0x2e5   :  { %3120 = vmatpush3.xpose.msk.msra.mxu0 %vm1129_vm2, %v1098_v19  ;;  %3134 = vmatprep.subr.mxu1 %v3571_v1 }
 0x2e6   :  { %3129 = vmatprep.subr.mxu0 %v3571_v1 }
 0x2e7   :  { %v1086_v20 = vpop.permute.xlu1 %1085 }
 0x2e8   :  { %v1102_v21 = vpop.permute.xlu0 %1101  ;;  %3127 = vmatmul.mubr.msk.f32.vlgmr.msra.gmra.mrb[16].mxu1 %vm1129_vm2, %v1086_v20 }
 0x2e9   :  { %3136 = vmatprep.mubr.msk.f32.mxu1 %vm3570_vm0, %v3571_v1 }
 0x2eb   :  { %v1104_v22 = vpop.permute.xlu1 %1103 }
 0x2ec   :  { %v1088_v23 = vpop.permute.xlu0 %1087  ;;  %3135 = vmatpush3.xpose.msk.msra.mxu1 %vm1129_vm2, %v1104_v22 }
 0x2ed   :  { %3144 = vmatprep.subr.mxu1 %v3571_v1 }
 0x2ef   :  { %v1084_v24 = vpop.permute.xlu1 %1083 }
 0x2f0   :  { %3122 = vmatmul.mubr.msk.f32.vlgmr.msra.gmra.mrb[6].mxu0 %vm1129_vm2, %v1084_v24  ;;  %v1106_v25 = vpop.permute.xlu0 %1105 }
 0x2f1   :  { %3130 = vmatpush3.xpose.msk.msra.mxu0 %vm1129_vm2, %v1102_v21  ;;  %3131 = vmatprep.mubr.msk.f32.mxu0 %vm3570_vm0, %v3571_v1 }
 0x2f2   :  { %3139 = vmatprep.subr.mxu0 %v3571_v1 }
 0x2f3   :  { %v1090_v27 = vpop.permute.xlu1 %1089 }
 0x2f4   :  { %3132 = vmatmul.mubr.msk.f32.vlgmr.msra.gmra.mrb[8].mxu0 %vm1129_vm2, %v1088_v23  ;;  %3137 = vmatmul.mubr.msk.f32.vlgmr.msra.gmra.mrb[18].mxu1 %vm1129_vm2, %v1090_v27  ;;  %v1092_v30 = vpop.permute.xlu0 %1091 }
 0x2f5   :  { %3140 = vmatpush3.xpose.msk.msra.mxu0 %vm1129_vm2, %v1106_v25  ;;  %3141 = vmatprep.mubr.msk.f32.mxu0 %vm3570_vm0, %v3571_v1 }
 0x2f6   :  { %3149 = vmatprep.subr.mxu0 %v3571_v1  ;;  %3146 = vmatprep.mubr.msk.f32.mxu1 %vm3570_vm0, %v3571_v1 }
 0x2f7   :  { %v1108_v31 = vpop.permute.xlu1 %1107 }
 0x2f8   :  { %3142 = vmatmul.mubr.msk.f32.vlgmr.msra.gmra.mrb[10].mxu0 %vm1129_vm2, %v1092_v30  ;;  %3145 = vmatpush3.xpose.msk.msra.mxu1 %vm1129_vm2, %v1108_v31 }
 0x2f9   :  { %3150 = vmatpush3.msra.mxu0 %v3912_v29  ;;  %3154 = vmatprep.subr.mxu1 %v3571_v1 }
 0x2fa   :  { %3151 = vmatprep.mubr.msk.f32.mxu0 %vm3570_vm0, %v3571_v1  ;;  %3159 = vmatprep.subr.mxu0 %v3571_v1 }
 0x2fb   :  { %v1094_v34 = vpop.permute.xlu1 %1093 }
 0x2fc   :  { %3147 = vmatmul.mubr.msk.f32.vlgmr.msra.gmra.mrb[20].mxu1 %vm1129_vm2, %v1094_v34 }
 0x2fd   :  { %3155 = vmatpush3.msra.mxu1 %v3921_v33  ;;  %3156 = vmatprep.mubr.msk.f32.mxu1 %vm3570_vm0, %v3571_v1 }
 0x2fe   :  { %3164 = vmatprep.subr.mxu1 %v3571_v1 }
 0x348   :  { %v1200_v35 = vpop.f32.mrb[12].mxu1 }
 0x349   :  { %v1722_v37 = vmul.f32 0.35355338, %v1200_v35  ;;  %v3113_v38 = vpop.f32.mrb[13].mxu1 }
 0x34b   :  { %v1730_v39 = vsel %vm1129_vm2, %v1722_v37, -inf }
 0x34c   :  { %1731 = vmax.xlane.f32.xlu0 %v1730_v39  ;;  %v1274_v40 = vpop.f32.mrb[14].mxu1 }
 0x34d   :  { %v1723_v41 = vmul.f32 0.35355338, %v1274_v40  ;;  %v3118_v43 = vpop.f32.mrb[15].mxu1 }
 0x34f   :  { %v1733_v44 = vsel %vm1129_vm2, %v1723_v41, -inf }
 0x350   :  { %1734 = vmax.xlane.f32.xlu1 %v1733_v44 }
 0x3bb   :  { %v1422_v45 = vpop.f32.mrb[16].mxu1 }
 0x3bc   :  { %v1725_v46 = vmul.f32 0.35355338, %v1422_v45  ;;  %v3128_v47 = vpop.f32.mrb[17].mxu1 }
 0x3be   :  { %v1739_v48 = vsel %vm1129_vm2, %v1725_v46, -inf }
 0x3bf   :  { %1740 = vmax.xlane.f32.xlu0 %v1739_v48 }
 0x3c3   :  { %v1348_v49 = vpop.f32.mrb[6].mxu0 }
 0x3c4   :  { %v1724_v50 = vmul.f32 0.35355338, %v1348_v49  ;;  %v3123_v51 = vpop.f32.mrb[7].mxu0 }
 0x3c6   :  { %v1736_v52 = vsel %vm1129_vm2, %v1724_v50, -inf }
 0x3c7   :  { %v1496_v53 = vpop.f32.mrb[8].mxu0  ;;  %1737 = vmax.xlane.f32.xlu0 %v1736_v52  ;;  %v1570_v54 = vpop.f32.mrb[18].mxu1 }
 0x3c8   :  { %v1726_v55 = vmul.f32 0.35355338, %v1496_v53  ;;  %v1727_v56 = vmul.f32 0.35355338, %v1570_v54  ;;  %v3133_v57 = vpop.f32.mrb[9].mxu0  ;;  %v3138_v32 = vpop.f32.mrb[19].mxu1 }
 0x3ca   :  { %v1742_v58 = vsel %vm1129_vm2, %v1726_v55, -inf  ;;  %v1745_v59 = vsel %vm1129_vm2, %v1727_v56, -inf }
 0x3cb   :  { %v1644_v60 = vpop.f32.mrb[10].mxu0  ;;  %1743 = vmax.xlane.f32.xlu0 %v1742_v58  ;;  %1746 = vmax.xlane.f32.xlu1 %v1745_v59 }
 0x3cc   :  { %v1728_v61 = vmul.f32 0.35355338, %v1644_v60  ;;  %v3143_v0 = vpop.f32.mrb[11].mxu0 }
 0x3ce   :  { %v1748_v4 = vsel %vm1129_vm2, %v1728_v61, -inf }
 0x3cf   :  { %1749 = vmax.xlane.f32.xlu0 %v1748_v4  ;;  %v1718_v5 = vpop.f32.mrb[20].mxu1 }
 0x3d0   :  { %v1729_v6 = vmul.f32 0.35355338, %v1718_v5  ;;  %v3148_v7 = vpop.f32.mrb[21].mxu1 }
 0x3d2   :  { %v1751_v8 = vsel %vm1129_vm2, %v1729_v6, -inf }
 0x3d3   :  { %1752 = vmax.xlane.f32.xlu1 %v1751_v8 }
 0x3d9   :  { %v1732_v9 = vpop.xlane.xlu0 %1731 }
 0x3da   :  { %v1754_v10 = vsub.f32 %v1722_v37, %v1732_v9 }
 0x3dc   :  { %v1762_v11 = vmul.f32 1.442695, %v1754_v10 }
 0x3dd   :  { %v1735_v12 = vpop.xlane.xlu1 %1734 }
 0x3de   :  { %3380 = vpow2.f32 %v1762_v11  ;;  %v1755_v13 = vsub.f32 %v1723_v41, %v1735_v12 }
 0x3e0   :  { %v1764_v14 = vmul.f32 1.442695, %v1755_v13 }
 0x3e2   :  { %3382 = vpow2.f32 %v1764_v14 }
 0x3e4   :  { %1113 = vrot.lane.b32.xlu1 %v3921_v33, %s3573_s23 }
 0x3e5   :  { %1111 = vrot.lane.b32.xlu0 %v3912_v29, %s3573_s23 }
 0x3e8   :  { %1117 = vrot.lane.b32.xlu1 %v3912_v29, %s3574_s25  ;;  %v3381_v15 = vpop.eup %3380 }
 0x3e9   :  { %v1778_v17 = vsel %vm1129_vm2, %v3381_v15, 0.0 }
 0x3ec   :  { %1119 = vrot.lane.b32.xlu1 %v3921_v33, %s3574_s25  ;;  %v3383_v18 = vpop.eup %3382 }
 0x3ed   :  { %v1781_v19 = vsel %vm1129_vm2, %v3383_v18, 0.0 }
 0x404   :  { %1779 = vadd.xlane.f32.xlu0 %v1778_v17 }
 0x410   :  { %1782 = vadd.xlane.f32.xlu1 %v1781_v19 }
 0x44c   :  { %v1741_v20 = vpop.xlane.xlu0 %1740 }
 0x44d   :  { %v1757_v21 = vsub.f32 %v1725_v46, %v1741_v20 }
 0x44f   :  { %v1768_v22 = vmul.f32 1.442695, %v1757_v21 }
 0x451   :  { %3384 = vpow2.f32 %v1768_v22 }
 0x454   :  { %v1738_v23 = vpop.xlane.xlu0 %1737 }
 0x455   :  { %v1756_v24 = vsub.f32 %v1724_v50, %v1738_v23 }
 0x457   :  { %v1766_v25 = vmul.f32 1.442695, %v1756_v24 }
 0x458   :  { %v1744_v27 = vpop.xlane.xlu0 %1743  ;;  %v1747_v28 = vpop.xlane.xlu1 %1746 }
 0x459   :  { %3386 = vpow2.f32 %v1766_v25  ;;  %v1758_v30 = vsub.f32 %v1726_v55, %v1744_v27  ;;  %v1759_v31 = vsub.f32 %v1727_v56, %v1747_v28 }
 0x45b   :  { %v3385_v34 = vpop.eup %3384  ;;  %v1770_v35 = vmul.f32 1.442695, %v1758_v30  ;;  %v1772_v37 = vmul.f32 1.442695, %v1759_v31 }
 0x45c   :  { %v1750_v38 = vpop.xlane.xlu0 %1749  ;;  %v1787_v39 = vsel %vm1129_vm2, %v3385_v34, 0.0 }
 0x45d   :  { %3388 = vpow2.f32 %v1770_v35  ;;  %v1760_v40 = vsub.f32 %v1728_v61, %v1750_v38  ;;  %1788 = vadd.xlane.f32.xlu1 %v1787_v39  ;;  %v2436_v38 = vld [vmem:[%s4132_s6 + $0x10] sm:$0xff]  ;;  %v2437_v39 = vld [vmem:[%s4132_s6 + $0x18] sm:$0xff] }
 0x45e   :  { %3390 = vpow2.f32 %v1772_v37 }
 0x45f   :  { %v1774_v41 = vmul.f32 1.442695, %v1760_v40  ;;  %v3310_v40 = vpack.c.bf16 %v2437_v39, %v2436_v38  ;;  %v2704_v39 = vld [vmem:[%s4136_s10] sm:$0xff] }
 0x460   :  { %v1753_v43 = vpop.xlane.xlu1 %1752  ;;  %v1112_v56 = vpop.permute.xlu0 %1111 }
 0x461   :  { %3392 = vpow2.f32 %v1774_v41  ;;  %v1761_v44 = vsub.f32 %v1729_v6, %v1753_v43 }
 0x463   :  { %v3387_v45 = vpop.eup %3386  ;;  %v1776_v46 = vmul.f32 1.442695, %v1761_v44 }
 0x464   :  { %v1784_v47 = vsel %vm1129_vm2, %v3387_v45, 0.0  ;;  %v1114_v57 = vpop.permute.xlu1 %1113 }
 0x465   :  { %3394 = vpow2.f32 %v1776_v46  ;;  %1785 = vadd.xlane.f32.xlu0 %v1784_v47 }
 0x467   :  { %v3389_v48 = vpop.eup %3388 }
 0x468   :  { %v3391_v49 = vpop.eup %3390  ;;  %v1790_v50 = vsel %vm1129_vm2, %v3389_v48, 0.0  ;;  %v1118_v58 = vpop.permute.xlu1 %1117 }
 0x469   :  { %1791 = vadd.xlane.f32.xlu0 %v1790_v50  ;;  %v1793_v51 = vsel %vm1129_vm2, %v3391_v49, 0.0 }
 0x46a   :  { %1794 = vadd.xlane.f32.xlu1 %v1793_v51 }
 0x46b   :  { %v3393_v52 = vpop.eup %3392 }
 0x46c   :  { %v1796_v53 = vsel %vm1129_vm2, %v3393_v52, 0.0  ;;  %v1120_v59 = vpop.permute.xlu1 %1119 }
 0x46d   :  { %1797 = vadd.xlane.f32.xlu0 %v1796_v53 }
 0x46f   :  { %v3951_v54 = vpop.eup %3394 }
 0x470   :  { %v1799_v55 = vsel %vm1129_vm2, %v3951_v54, 0.0 }
 0x471   :  { %1800 = vadd.xlane.f32.xlu1 %v1799_v55 }
 0x482   :  { %1125 = vrot.lane.b32.xlu1 %v3921_v33, %s3575_s26 }
 0x483   :  { %1123 = vrot.lane.b32.xlu0 %v3912_v29, %s3575_s26 }
 0x491   :  { %v1780_v32 = vpop.xlane.xlu0 %1779 }
 0x492   :  { %3396 = vrcp.f32 %v1780_v32 }
 0x49c   :  { %v3397_v60 = vpop.eup %3396 }
 0x49d   :  { %v1810_v61 = vmul.f32 %v3397_v60, %v3381_v15  ;;  %v1783_v0 = vpop.xlane.xlu1 %1782 }
 0x49e   :  { %3398 = vrcp.f32 %v1783_v0 }
 0x49f   :  { %3152 = vmatmul.mubr.msk.f32.vlgmr.msra.gmra.mrb[12].mxu0 %vm1129_vm2, %v1810_v61 }
 0x4a0   :  { %3160 = vmatpush3.msra.mxu0 %v1112_v56  ;;  %3161 = vmatprep.mubr.msk.f32.mxu0 %vm3570_vm0, %v3571_v1 }
 0x4a1   :  { %3169 = vmatprep.subr.mxu0 %v3571_v1 }
 0x4a8   :  { %v3399_v33 = vpop.eup %3398 }
 0x4a9   :  { %v1811_v29 = vmul.f32 %v3399_v33, %v3383_v18  ;;  %v2842_v33 = vld [vmem:[#allocation7 + $0x2] ss:$0 sm:$0xff] }
 0x4ab   :  { %3157 = vmatmul.mubr.msk.f32.vlgmr.msra.gmra.mrb[22].mxu1 %vm1129_vm2, %v1811_v29  ;;  %v412_v29 = vadd.f32 %v2842_v33, %v3818_v16 }
 0x4ac   :  { %3165 = vmatpush3.msra.mxu1 %v1114_v57  ;;  %3166 = vmatprep.mubr.msk.f32.mxu1 %vm3570_vm0, %v3571_v1 }
 0x4ad   :  { %3174 = vmatprep.subr.mxu1 %v3571_v1 }
 0x4ea   :  { %v1789_v4 = vpop.xlane.xlu1 %1788 }
 0x4eb   :  { %3400 = vrcp.f32 %v1789_v4  ;;  %v422_v4 = vrot.slane %v412_v29, %v3820_v26 }
 0x4f2   :  { %v1786_v5 = vpop.xlane.xlu0 %1785 }
 0x4f3   :  { %3402 = vrcp.f32 %v1786_v5  ;;  %v423_v5 = vcombine.high %v422_v4, %v422_v4 }
 0x4f5   :  { %v3401_v6 = vpop.eup %3400 }
 0x4f6   :  { %v1813_v7 = vmul.f32 %v3401_v6, %v3385_v34  ;;  %v1792_v8 = vpop.xlane.xlu0 %1791  ;;  %v2434_v34 = vld [vmem:[%s4132_s6] sm:$0xff]  ;;  %v437_v6 = vrot.slane %v423_v5, %v3820_v26 }
 0x4f7   :  { %3404 = vrcp.f32 %v1792_v8  ;;  %v1795_v9 = vpop.xlane.xlu1 %1794  ;;  %v2893_v8 = vld [vmem:[#allocation8] ss:$0 sm:$0xff] }
 0x4f8   :  { %3406 = vrcp.f32 %v1795_v9  ;;  %3167 = vmatmul.mubr.msk.f32.vlgmr.msra.gmra.mrb[24].mxu1 %vm1129_vm2, %v1813_v7  ;;  %v430_v7 = vrot.slane %v422_v4, %v3820_v26 }
 0x4f9   :  { %3175 = vmatpush3.msra.mxu1 %v1120_v59  ;;  %3176 = vmatprep.mubr.msk.f32.mxu1 %vm3570_vm0, %v3571_v1 }
 0x4fa   :  { %v1798_v10 = vpop.xlane.xlu0 %1797  ;;  %3184 = vmatprep.subr.mxu1 %v3571_v1 }
 0x4fb   :  { %3408 = vrcp.f32 %v1798_v10 }
 0x4fd   :  { %v3403_v11 = vpop.eup %3402 }
 0x4fe   :  { %v1812_v12 = vmul.f32 %v3403_v11, %v3387_v45  ;;  %v1801_v13 = vpop.xlane.xlu1 %1800  ;;  %v1124_v20 = vpop.permute.xlu0 %1123  ;;  %v2533_v11 = vrot.slane %v437_v6, %v3826_v42 }
 0x4ff   :  { %3410 = vrcp.f32 %v1801_v13 }
 0x500   :  { %3162 = vmatmul.mubr.msk.f32.vlgmr.msra.gmra.mrb[14].mxu0 %vm1129_vm2, %v1812_v12 }
 0x501   :  { %v3405_v14 = vpop.eup %3404  ;;  %3170 = vmatpush3.msra.mxu0 %v1118_v58  ;;  %3171 = vmatprep.mubr.msk.f32.mxu0 %vm3570_vm0, %v3571_v1 }
 0x502   :  { %v3407_v15 = vpop.eup %3406  ;;  %v1814_v17 = vmul.f32 %v3405_v14, %v3389_v48  ;;  %3179 = vmatprep.subr.mxu0 %v3571_v1  ;;  %v1126_v19 = vpop.permute.xlu1 %1125  ;;  %v2529_v14 = vrot.slane %v430_v7, %v3826_v42 }
 0x503   :  { %v1815_v18 = vmul.f32 %v3407_v15, %v3391_v49 }
 0x504   :  { %3172 = vmatmul.mubr.msk.f32.vlgmr.msra.gmra.mrb[16].mxu0 %vm1129_vm2, %v1814_v17 }
 0x505   :  { %v3409_v21 = vpop.eup %3408  ;;  %3177 = vmatmul.mubr.msk.f32.vlgmr.msra.gmra.mrb[26].mxu1 %vm1129_vm2, %v1815_v18  ;;  %3180 = vmatpush3.msra.mxu0 %v1124_v20 }
 0x506   :  { %v1816_v22 = vmul.f32 %v3409_v21, %v3393_v52  ;;  %3185 = vmatpush3.msra.mxu1 %v1126_v19  ;;  %3181 = vmatprep.mubr.msk.f32.mxu0 %vm3570_vm0, %v3571_v1 }
 0x507   :  { %3186 = vmatprep.mubr.msk.f32.mxu1 %vm3570_vm0, %v3571_v1  ;;  %v2435_v1 = vld [vmem:[%s4132_s6 + $0x8] sm:$0xff] }
 0x508   :  { %3182 = vmatmul.mubr.msk.f32.vlgmr.msra.gmra.mrb[18].mxu0 %vm1129_vm2, %v1816_v22  ;;  %v3306_v37 = vpack.c.bf16 %v2435_v1, %v2434_v34  ;;  %v2595_v34 = vld [vmem:[%s4134_s8 + $0x8] sm:$0xff] }
 0x509   :  { %v3411_v23 = vpop.eup %3410 }
 0x50a   :  { %v1817_v24 = vmul.f32 %v3411_v23, %v3951_v54  ;;  %3307 = vmatprep.subr.bf16.mxu0 %v3306_v37 }
 0x50b   :  { %3309 = vmatpush3.bf16.msra.mxu0 %v3306_v37  ;;  %v2597_v37 = vld [vmem:[%s4134_s8 + $0x18] sm:$0xff] }
 0x50c   :  { %3187 = vmatmul.mubr.msk.f32.vlgmr.msra.gmra.mrb[28].mxu1 %vm1129_vm2, %v1817_v24  ;;  %3311 = vmatprep.subr.bf16.mxu0 %v3310_v40 }
 0x50f   :  { %3313 = vmatpush3.bf16.msra.mxu0 %v3310_v40  ;;  %v2705_v40 = vld [vmem:[%s4136_s10 + $0x8] sm:$0xff] }
 0x572   :  { %v1887_v25 = vpop.f32.mrb[12].mxu0 }
 0x573   :  { %v3153_v27 = vpop.f32.mrb[13].mxu0 }
 0x57e   :  { %v1960_v28 = vpop.f32.mrb[22].mxu1 }
 0x57f   :  { %v3158_v30 = vpop.f32.mrb[23].mxu1 }
 0x5cb   :  { %v2106_v31 = vpop.f32.mrb[24].mxu1 }
 0x5cc   :  { %2406 = vrot.lane.b32.xlu1 %v2106_v31, %s3563_s16  ;;  %v3168_v35 = vpop.f32.mrb[25].mxu1  ;;  %v2594_v31 = vld [vmem:[%s4134_s8] sm:$0xff] }
 0x5cd   :  { %v3314_v1 = vpack.c.bf16 %v2595_v34, %v2594_v31  ;;  %v2596_v35 = vld [vmem:[%s4134_s8 + $0x10] sm:$0xff]  ;;  %v2719_v34 = vld [vmem:[%s4136_s10 + $0x78] sm:$0xff] }
 0x5ce   :  { %v3318_v38 = vpack.c.bf16 %v2597_v37, %v2596_v35  ;;  %v2718_v31 = vld [vmem:[%s4136_s10 + $0x70] sm:$0xff]  ;;  %v2896_v35 = vld [vmem:[#allocation10] ss:$0 sm:$0xff] }
 0x5cf   :  { %3315 = vmatprep.subr.bf16.mxu1 %v3314_v1 }
 0x5d0   :  { %3317 = vmatpush3.bf16.msra.mxu1 %v3314_v1  ;;  %v3350_v1 = vpack.c.bf16 %v2719_v34, %v2718_v31 }
 0x5d1   :  { %3319 = vmatprep.subr.bf16.mxu1 %v3318_v38 }
 0x5d3   :  { %v2033_v41 = vpop.f32.mrb[14].mxu0 }
 0x5d4   :  { %2404 = vrot.lane.b32.xlu0 %v2033_v41, %s3563_s16  ;;  %v3163_v43 = vpop.f32.mrb[15].mxu0  ;;  %3321 = vmatpush3.bf16.msra.mxu1 %v3318_v38  ;;  %v3322_v41 = vpack.c.bf16 %v2705_v40, %v2704_v39 }
 0x5d5   :  { %v2846_v43 = vld [vmem:[#allocation7 + $0x4] ss:$0 sm:$0xff] }
 0x5d6   :  { %3323 = vmatprep.subr.bf16.mxu0 %v3322_v41 }
 0x5d7   :  { %v2179_v44 = vpop.f32.mrb[16].mxu0 }
 0x5d8   :  { %v2252_v45 = vpop.f32.mrb[26].mxu1  ;;  %2412 = vrot.lane.b32.xlu0 %v2179_v44, %s3566_s0  ;;  %v3173_v46 = vpop.f32.mrb[17].mxu0  ;;  %v624_v44 = vadd.f32 %v2846_v43, %v3855_v62 }
 0x5d9   :  { %2414 = vrot.lane.b32.xlu1 %v2252_v45, %s3566_s0  ;;  %v3178_v47 = vpop.f32.mrb[27].mxu1 }
 0x5da   :  { %v2844_v47 = vld [vmem:[#allocation7 + $0x3] ss:$0 sm:$0xff] }
 0x5db   :  { %v2325_v48 = vpop.f32.mrb[18].mxu0 }
 0x5dc   :  { %2420 = vrot.lane.b32.xlu0 %v2325_v48, %s3576_s30  ;;  %v3183_v49 = vpop.f32.mrb[19].mxu0 }
 0x5dd   :  { %v634_v49 = vrot.slane %v624_v44, %v3820_v26 }
 0x5df   :  { %v2398_v50 = vpop.f32.mrb[28].mxu1 }
 0x5e0   :  { %2422 = vrot.lane.b32.xlu1 %v2398_v50, %s3576_s30  ;;  %v3188_v51 = vpop.f32.mrb[29].mxu1 }
 0x63e   :  { %v2407_v53 = vpop.permute.xlu1 %2406 }
 0x63f   :  { %v2427_v59 = vsel %vm1129_vm2, %v1960_v28, %v2407_v53 }
 0x646   :  { %v2405_v52 = vpop.permute.xlu0 %2404 }
 0x647   :  { %v2426_v55 = vsel %vm1129_vm2, %v1887_v25, %v2405_v52  ;;  %v518_v52 = vadd.f32 %v2844_v47, %v3853_v36 }
 0x64a   :  { %v2413_v54 = vpop.permute.xlu0 %2412 }
 0x64b   :  { %v2429_v56 = vsel %vm2428_vm3, %v2426_v55, %v2413_v54  ;;  %v2415_v57 = vpop.permute.xlu1 %2414  ;;  %v635_v54 = vcombine.high %v634_v49, %v634_v49  ;;  %v642_v55 = vrot.slane %v634_v49, %v3820_v26 }
 0x64c   :  { %v2430_v60 = vsel %vm2428_vm3, %v2427_v59, %v2415_v57 }
 0x64d   :  { %v649_v62 = vrot.slane %v635_v54, %v3820_v26  ;;  %v2566_v57 = vadd.f32 1.0, %v642_v55 }
 0x64e   :  { %v2421_v32 = vpop.permute.xlu0 %2420 }
 0x64f   :  { %v2432_v58 = vsel %vm2431_vm4, %v2429_v56, %v2421_v32  ;;  %v528_v56 = vrot.slane %v518_v52, %v3820_v26 }
 0x650   :  { %3197 = vmatprep.mubr.msk.f32.mxu0 %vm127_vm1, %v2432_v58 }
 0x651   :  { %v529_v32 = vcombine.high %v528_v56, %v528_v56  ;;  %v536_v58 = vrot.slane %v528_v56, %v3820_v26 }
 0x652   :  { %v2423_v61 = vpop.permute.xlu1 %2422 }
 0x653   :  { %v2433_v0 = vsel %vm2431_vm4, %v2430_v60, %v2423_v61  ;;  %v2567_v60 = vadd.f32 1.0, %v649_v62  ;;  %v2573_v61 = vrot.slane %v2566_v57, %v3826_v42  ;;  %v543_v36 = vrot.slane %v529_v32, %v3820_v26 }
 0x654   :  { %3198 = vmatmul.mubr.msk.f32.vlgmr.msra.gmra.mrb[20].mxu0 %vm127_vm1, %v2433_v0  ;;  %v2585_v33 = vrot.slane %v536_v58, %v3826_v42  ;;  %v2848_v58 = vld [vmem:[#allocation7 + $0x5] ss:$0 sm:$0xff] }
 0x655   :  { %3325 = vmatpush3.bf16.msra.mxu0 %v3322_v41  ;;  %v2577_v5 = vrot.slane %v2567_v60, %v3826_v42 }
 0x727   :  { %v3199_v9 = vpop.f32.mrb[20].mxu0 }
 0x728   :  { %v2523_v10 = vadd.f32 %v3199_v9, %v2893_v8  ;;  %v2517_v12 = vpop.f32.mrb[21].mxu0 }
 0x729   :  { %v2518_v13 = vadd.f32 %v2893_v8, %v2517_v12  ;;  %v2589_v8 = vrot.slane %v543_v36, %v3826_v42  ;;  %v2707_v12 = vld [vmem:[%s4136_s10 + $0x18] sm:$0xff] }
 0x72a   :  { %v2537_v15 = vmul.f32 %v2533_v11, %v2523_v10  ;;  %v2706_v11 = vld [vmem:[%s4136_s10 + $0x10] sm:$0xff] }
 0x72b   :  { %v2536_v17 = vmul.f32 %v2529_v14, %v2518_v13  ;;  %v3326_v13 = vpack.c.bf16 %v2707_v12, %v2706_v11  ;;  %v2708_v14 = vld [vmem:[%s4136_s10 + $0x20] sm:$0xff] }
 0x72c   :  { %v4011_v16 = vadd.f32 %v2537_v15, %v3734_v3  ;;  %v2709_v15 = vld [vmem:[%s4136_s10 + $0x28] sm:$0xff] }
 0x72d   :  { %v4014_v18 = vadd.f32 %v2536_v17, %v3732_v2  ;;  %3327 = vmatprep.subr.bf16.mxu0 %v3326_v13  ;;  %v3330_v17 = vpack.c.bf16 %v2709_v15, %v2708_v14 }
 0x72e   :  { %v2543_v19 = vsel %vm127_vm1, %v4011_v16, 0.0  ;;  %3329 = vmatpush3.bf16.msra.mxu0 %v3326_v13 }
 0x72f   :  { %2544 = vadd.xlane.f32.xlu1 %v2543_v19  ;;  %v2540_v20 = vsel %vm127_vm1, %v4014_v18, 0.0  ;;  %3331 = vmatprep.subr.bf16.mxu0 %v3330_v17  ;;  %v2710_v19 = vld [vmem:[%s4136_s10 + $0x30] sm:$0xff] }
 0x730   :  { %2541 = vadd.xlane.f32.xlu0 %v2540_v20  ;;  %v2711_v20 = vld [vmem:[%s4136_s10 + $0x38] sm:$0xff] }
 0x732   :  { %3333 = vmatpush3.bf16.msra.mxu0 %v3330_v17 }
 0x7bc   :  { %v2545_v21 = vpop.xlane.xlu1 %2544 }
 0x7bd   :  { %v2547_v22 = vmul.f32 0.03125, %v2545_v21  ;;  %v2542_v23 = vpop.xlane.xlu0 %2541  ;;  %v2712_v21 = vld [vmem:[%s4136_s10 + $0x40] sm:$0xff] }
 0x7be   :  { %v2546_v24 = vmul.f32 0.03125, %v2542_v23  ;;  %v2713_v23 = vld [vmem:[%s4136_s10 + $0x48] sm:$0xff] }
 0x7bf   :  { %v2549_v25 = vsub.f32 %v4011_v16, %v2547_v22  ;;  %v3334_v22 = vpack.c.bf16 %v2711_v20, %v2710_v19 }
 0x7c0   :  { %v2548_v3 = vsub.f32 %v4014_v18, %v2546_v24  ;;  %v3338_v24 = vpack.c.bf16 %v2713_v23, %v2712_v21 }
 0x7c1   :  { %v2551_v28 = vmul.f32 %v2549_v25, %v2549_v25  ;;  %3335 = vmatprep.subr.bf16.mxu0 %v3334_v22 }
 0x7c2   :  { %v2550_v27 = vmul.f32 %v2548_v3, %v2548_v3  ;;  %3337 = vmatpush3.bf16.msra.mxu0 %v3334_v22 }
 0x7c3   :  { %v2555_v30 = vsel %vm127_vm1, %v2551_v28, 0.0  ;;  %3339 = vmatprep.subr.bf16.mxu0 %v3338_v24  ;;  %v2717_v28 = vld [vmem:[%s4136_s10 + $0x68] sm:$0xff] }
 0x7c4   :  { %v2552_v2 = vsel %vm127_vm1, %v2550_v27, 0.0 }
 0x7c5   :  { %2553 = vadd.xlane.f32.xlu0 %v2552_v2  ;;  %v2716_v2 = vld [vmem:[%s4136_s10 + $0x60] sm:$0xff] }
 0x7c6   :  { %3341 = vmatpush3.bf16.msra.mxu0 %v3338_v24 }
 0x7c9   :  { %2556 = vadd.xlane.f32.xlu0 %v2555_v30  ;;  %v3346_v30 = vpack.c.bf16 %v2717_v28, %v2716_v2 }
 0x852   :  { %v2554_v45 = vpop.xlane.xlu0 %2553 }
 0x853   :  { %v2558_v46 = vmul.f32 0.03125, %v2554_v45 }
 0x855   :  { %v2560_v48 = vadd.f32 1e-06, %v2558_v46 }
 0x856   :  { %v2557_v50 = vpop.xlane.xlu0 %2556 }
 0x857   :  { %3412 = vrsqrt.f32 %v2560_v48  ;;  %v2559_v51 = vmul.f32 0.03125, %v2557_v50 }
 0x859   :  { %v2561_v53 = vadd.f32 1e-06, %v2559_v51 }
 0x85b   :  { %3414 = vrsqrt.f32 %v2561_v53 }
 0x861   :  { %v3413_v59 = vpop.eup %3412 }
 0x862   :  { %v2564_v0 = vmul.f32 %v3413_v59, %v2548_v3  ;;  %v2715_v3 = vld [vmem:[%s4136_s10 + $0x58] sm:$0xff]  ;;  %v732_v59 = vadd.f32 %v2848_v58, %v3857_v63 }
 0x864   :  { %v2580_v29 = vmul.f32 %v2573_v61, %v2564_v0  ;;  %v742_v60 = vrot.slane %v732_v59, %v3820_v26 }
 0x865   :  { %v3415_v4 = vpop.eup %3414 }
 0x866   :  { %v2565_v6 = vmul.f32 %v3415_v4, %v2549_v25  ;;  %v2592_v7 = vadd.f32 %v2585_v33, %v2580_v29  ;;  %v2714_v25 = vld [vmem:[%s4136_s10 + $0x50] sm:$0xff]  ;;  %v743_v61 = vcombine.high %v742_v60, %v742_v60  ;;  %v750_v36 = vrot.slane %v742_v60, %v3820_v26  ;;  %v2899_v33 = vld [vmem:[%s4137_s11] ss:$0 sm:$0xff]  ;;  %s3530_s11 = scalar_lea.vmem %s2824_s24, 256 }
 0x867   :  { %v3342_v27 = vpack.c.bf16 %v2715_v3, %v2714_v25  ;;  %p3531_p12 = scmp.ne.s32.totalorder %s2824_s24, %s3530_s11  ;;  %p3536_p0 = scmp.lt.s32.totalorder %s3530_s11, %s3530_s11 }
 0x868   :  { %v2581_v9 = vmul.f32 %v2577_v5, %v2565_v6  ;;  %3208 = vmatprep.mubr.msk.f32.mxu1 %vm127_vm1, %v2592_v7  ;;  %v757_v0 = vrot.slane %v743_v61, %v3820_v26 }
 0x869   :  { %3343 = vmatprep.subr.bf16.mxu0 %v3342_v27  ;;  %p3537_p1 = por %p3536_p0, %p3535_p13 }
 0x86a   :  { %v2593_v10 = vadd.f32 %v2589_v8, %v2581_v9  ;;  %3345 = vmatpush3.bf16.msra.mxu0 %v3342_v27  ;;  %v2809_v5 = vrot.slane %v757_v0, %v3826_v42  ;;  %v2805_v8 = vrot.slane %v750_v36, %v3826_v42 }
 0x86b   :  { %3347 = vmatprep.subr.bf16.mxu0 %v3346_v30  ;;  %p3538_p2 = pnand %p3537_p1, %p3531_p12 }
 0x86c   :  { %3209 = vmatmul.mubr.msk.f32.vlgmr.msra.gmra.mrb[30].mxu1 %vm127_vm1, %v2593_v10 }
 0x86e   :  { %3349 = vmatpush3.bf16.msra.mxu0 %v3346_v30 }
 0x86f   :  { %3351 = vmatprep.subr.bf16.mxu0 %v3350_v1 }
 0x872   :  { %3353 = vmatpush3.bf16.msra.mxu0 %v3350_v1 }
 0x93f   :  { %v3210_v37 = vpop.f32.mrb[30].mxu1 }
 0x940   :  { %v2683_v38 = vadd.f32 %v3210_v37, %v2896_v35  ;;  %v2677_v39 = vpop.f32.mrb[31].mxu1 }
 0x941   :  { %v2678_v40 = vadd.f32 %v2896_v35, %v2677_v39 }
 0x942   :  { %v2689_v41 = vmul.f32 0.044715, %v2683_v38  ;;  %v2687_v62 = vmul.f32 0.5, %v2683_v38 }
 0x943   :  { %v2688_v43 = vmul.f32 0.044715, %v2678_v40  ;;  %v2686_v55 = vmul.f32 0.5, %v2678_v40 }
 0x944   :  { %v2691_v44 = vmul.f32 %v2689_v41, %v2683_v38 }
 0x945   :  { %v2690_v45 = vmul.f32 %v2688_v43, %v2678_v40 }
 0x946   :  { %v2693_v46 = vmul.f32 %v2691_v44, %v2683_v38 }
 0x947   :  { %v2692_v47 = vmul.f32 %v2690_v45, %v2678_v40 }
 0x948   :  { %v2695_v48 = vadd.f32 %v2693_v46, %v2683_v38 }
 0x949   :  { %v2694_v49 = vadd.f32 %v2692_v47, %v2678_v40 }
 0x94a   :  { %v2697_v50 = vmul.f32 0.7978846, %v2695_v48 }
 0x94b   :  { %v2696_v51 = vmul.f32 0.7978846, %v2694_v49 }
 0x94c   :  { %3416 = vtanh.f32 %v2697_v50 }
 0x94d   :  { %3418 = vtanh.f32 %v2696_v51 }
 0x956   :  { %v3417_v52 = vpop.eup %3416 }
 0x957   :  { %v3419_v53 = vpop.eup %3418  ;;  %v2701_v54 = vadd.f32 1.0, %v3417_v52 }
 0x958   :  { %v2700_v56 = vadd.f32 1.0, %v3419_v53 }
 0x959   :  { %v2703_v32 = vmul.f32 %v2701_v54, %v2687_v62 }
 0x95a   :  { %v2702_v57 = vmul.f32 %v2700_v56, %v2686_v55 }
 0x95c   :  { %3243 = vmatprep.mubr.f32.mxu0 %v2702_v57 }
 0x95d   :  { %3244 = vmatmul.mubr.f32.vlgmr.msra.gmra.mrb[22].mxu0 %v2703_v32 }
 0xa30   :  { %v3245_v29 = vpop.f32.mrb[22].mxu0 }
 0xa31   :  { %v2799_v4 = vadd.f32 %v3245_v29, %v2899_v33  ;;  %v2793_v6 = vpop.f32.mrb[23].mxu0 }
 0xa32   :  { %v2794_v7 = vadd.f32 %v2899_v33, %v2793_v6 }
 0xa33   :  { %v2813_v63 = vmul.f32 %v2809_v5, %v2799_v4 }
 0xa34   :  { %v2812_v9 = vmul.f32 %v2805_v8, %v2794_v7 }
 0xa35   :  { %v2815_v10 = vadd.f32 %v2813_v63, %v4011_v16 }
 0xa36   :  { %v2814_v26 = vadd.f32 %v2812_v9, %v4014_v18 }
 0xa37   :  { %2817 = vst.msk [vmem:[#allocation11 + $0x8] sm:$0xff] %vm127_vm1, %v2815_v10 }
 0xa38   :  { %2816 = vst.msk [vmem:[#allocation11] sm:$0xff] %vm127_vm1, %v2814_v26 }
 0xa39   :  { %3541 = shalt.err (!%p3538_p2)
}
 0xa3a   :  { %s3542_s28 = scalar_lea.hbm %s4138_s12, 256 }
 0xa3b   :  { %p3543_p3 = scmp.ne.s32.totalorder %s4138_s12, %s3542_s28  ;;  %p3546_p4 = scmp.lt.u32.totalorder %s3542_s28, %s4138_s12 }
 0xa3d   :  { %p3548_p5 = pnand %p3546_p4, %p3543_p3 }
 0xa3f   :  { %3551 = shalt.err (!%p3548_p5)
}
 0xa40   :  { %2829 = dma.vmem_to_hbm [thread:$0]  %s2824_s24, 256, %s4138_s12, [#allocation4], %s3562_s15, %s3562_s15, %s3563_s16  }
 0xa41   :  { %3558 = dma.done.wait [#allocation4], 256  }
 0xa42   :  { %3559 = vsyncadd [#allocation4], 4294967040 }
 0xa43   :  { %2833 = vsyncpa [#allocation3], 1 }
 0xa44   :  { %2834 = vsyncpa [#allocation6], 1 }
 0xa45   :  { %2835 = vsyncpa [#allocation9], 1 }
 0xa46   :  { %2836 = vsyncpa [#allocation4], 1 }

</bundles_post_ra>
